<compile_context>
chip_gen: v5e
topology: v5e:2x2
jax: 0.10.0
libtpu: 0.0.40
codegen_flags: <defaults>
</compile_context>

<pallas_src>
import jax
import jax.numpy as jnp
import numpy as np
from jax.experimental import pallas as pl
from jax.experimental.pallas import tpu as pltpu


def attention_pool_kernel(x_ref, mask_ref, maskt_ref, wq_ref, wk_ref, wv_ref,
                          wc_ref, posq_ref, poskm_ref, posks_ref, posvm_ref,
                          posvs_ref, bc_ref, out_ref):
    bt, hw, c = x_ref.shape
    nh = mask_ref.shape[1]
    f32, bf16 = jnp.float32, jnp.bfloat16

    x = x_ref[...]                                    # (bt, hw, c)  bf16
    xf = x.reshape(bt * hw, c)                        # flattened spatial tokens

    # ---- big spatial K/V projections: bf16 operands, f32 MXU accumulation ----
    k_raw = jnp.dot(xf, wk_ref[...], preferred_element_type=f32).reshape(bt, hw, c)
    v_raw = jnp.dot(xf, wv_ref[...], preferred_element_type=f32).reshape(bt, hw, c)

    # Mean-token K/V derived from the spatial projections:
    # mean_hw(x @ W) == mean_hw(x) @ W  -> no extra tiny-M matmuls.
    k_mn = jnp.mean(k_raw, axis=1) + poskm_ref[...]   # (bt, c) f32
    v_mn = jnp.mean(v_raw, axis=1) + posvm_ref[...]   # (bt, c) f32

    # Spatial K/V kept in bf16 after the positional-bias add (halves the
    # dominant (bt, hw, c) VMEM / vreg footprint; accumulation stays f32).
    k_sp = (k_raw + posks_ref[...]).astype(bf16)      # (bt, hw, c) bf16
    v_sp = (v_raw + posvs_ref[...]).astype(bf16)      # (bt, hw, c) bf16

    # ---- query from the mean token (1/sqrt(head_dim) and pos folded in wrapper) ----
    xm = jnp.mean(x.astype(f32), axis=1).astype(bf16)                           # (bt, c)
    q = jnp.dot(xm, wq_ref[...], preferred_element_type=f32) + posq_ref[...]    # (bt, c) f32
    q_bf = q.astype(bf16)

    # ---- per-head scores via 0/1 head-indicator matmul (bf16 operands) ----
    mask = mask_ref[...]                              # (c, nh) bf16, exact 0/1
    kq = (k_sp * q_bf[:, None, :]).reshape(bt * hw, c)                          # bf16
    s_sp = jnp.dot(kq, mask, preferred_element_type=f32).reshape(bt, hw, nh)
    s_mn = jnp.dot((k_mn * q).astype(bf16), mask, preferred_element_type=f32)   # (bt, nh)

    # ---- softmax over keys (hw spatial + 1 mean token), all f32 ----
    m = jnp.maximum(jnp.max(s_sp, axis=1), s_mn)                                # (bt, nh)
    e_sp = jnp.exp(s_sp - m[:, None, :])
    e_mn = jnp.exp(s_mn - m)
    inv = 1.0 / (jnp.sum(e_sp, axis=1) + e_mn)                                  # (bt, nh)
    p_sp = (e_sp * inv[:, None, :]).astype(bf16)                                # (bt, hw, nh)
    p_mn = e_mn * inv                                                           # (bt, nh) f32

    # ---- expand per-head probs back to channels (bf16 operands, f32 accum) ----
    mask_t = maskt_ref[...]                           # (nh, c) bf16
    p_sp_c = jnp.dot(p_sp.reshape(bt * hw, nh), mask_t,
                     preferred_element_type=f32).reshape(bt, hw, c)
    p_mn_c = jnp.dot(p_mn.astype(bf16), mask_t, preferred_element_type=f32)     # (bt, c)

    # weighted value sum over keys, f32 accumulation
    attn = jnp.sum(p_sp_c * v_sp, axis=1) + p_mn_c * v_mn                       # (bt, c)

    # ---- output projection; out_ref is a lane-dense (bt, dout_pad) block ----
    out_ref[...] = (jnp.dot(attn.astype(bf16), wc_ref[...],
                            preferred_element_type=f32) + bc_ref[...])


def _physical_vmem_bytes():
    """Per-TensorCore VMEM capacity; conservative 64 MiB fallback (v7x-safe)."""
    try:
        return int(pltpu.get_tpu_info().vmem_capacity_bytes)
    except Exception:
        return 64 * 2**20


def _pick_block_b(batch, hw, c, const_bytes, dout_pad, vmem_budget):
    """Pick a batch tile that (a) keeps the full per-step working set (input,
    bf16 + f32 intermediates, output) plus the single-buffered constants under
    the generation-aware VMEM budget, (b) is a multiple of 8 sublanes (or the
    whole batch), and (c) keeps the grid >= 2 steps — even when possible —
    for megacore balance."""
    per_elem = hw * c * (2 * 2      # streamed bf16 input, double-buffered
                         + 3 * 2    # k_sp / v_sp / k*q bf16 intermediates
                         + 3 * 4    # k_raw / v_raw / prob-expansion f32 transients
                         ) + 2 * dout_pad * 4
    cands = [d for d in range(1, batch + 1)
             if batch % d == 0 and (d % 8 == 0 or d == batch)]
    fits = [d for d in cands if const_bytes + d * per_elem <= vmem_budget]
    pool = fits or [min(cands)]
    multi = [d for d in pool if batch // d >= 2]
    if multi:
        even = [d for d in multi if (batch // d) % 2 == 0]
        return max(even or multi)
    return max(pool)


def attention_pool_2d(x_nchw, params, num_heads, block_b=None):
    B, C, H, W = x_nchw.shape
    HW = H * W
    Dout = params["wc"].shape[1]
    assert C % num_heads == 0
    head_dim = C // num_heads
    scale = head_dim ** -0.5
    dout_pad = ((Dout + 127) // 128) * 128

    f32, bf16 = jnp.float32, jnp.bfloat16

    # Token layout (B, HW, C); cast to bf16 before the transpose so the extra
    # HBM pass is half width.
    # TODO(synk): fold this NCHW->NHWC transpose into the kernel (or have the
    # upstream producer emit NHWC/bf16 directly) to remove the extra HBM pass.
    tokens = jnp.transpose(x_nchw.astype(bf16).reshape(B, C, HW), (0, 2, 1))

    pos = params["pos"].astype(f32)
    wq, bq = params["wq"].astype(f32), params["bq"].astype(f32)
    wk, bk = params["wk"].astype(f32), params["bk"].astype(f32)
    wv, bv = params["wv"].astype(f32), params["bv"].astype(f32)
    wc, bc = params["wc"].astype(f32), params["bc"].astype(f32)

    # Fold 1/sqrt(head_dim) and the positional-embedding contribution into
    # tiny per-call precomputed biases (one-off f32 matmuls outside the kernel).
    posq = (pos[0:1] @ wq + bq) * scale          # (1, C)    query-token bias
    posk = pos @ wk + bk                         # (L, C)
    posv = pos @ wv + bv                         # (L, C)
    poskm, posks = posk[0:1], posk[1:]           # mean-token / spatial K biases
    posvm, posvs = posv[0:1], posv[1:]

    wq_b = (wq * scale).astype(bf16)
    wk_b = wk.astype(bf16)
    wv_b = wv.astype(bf16)
    wc_b = jnp.zeros((C, dout_pad), bf16).at[:, :Dout].set(wc.astype(bf16))
    bc_b = jnp.zeros((1, dout_pad), f32).at[:, :Dout].set(bc)

    # 0/1 head-indicator masks (exact in bf16); transpose precomputed so the
    # kernel never does an in-VMEM transpose.
    head_mask = (jnp.arange(C)[:, None] // head_dim
                 == jnp.arange(num_heads)[None, :]).astype(bf16)
    head_mask_t = head_mask.T                     # (nh, C)

    consts = [head_mask, head_mask_t, wq_b, wk_b, wv_b, wc_b,
              posq, poskm, posks, posvm, posvs, bc_b]
    const_bytes = sum(int(a.size) * a.dtype.itemsize for a in consts)

    # Generation-aware VMEM budget: leave >=16 MiB headroom below physical.
    # v7x (64 MiB/TC) -> ~48 MiB; v5e/v6e (128 MiB) -> ~110 MiB.
    phys_vmem = _physical_vmem_bytes()
    vmem_budget = int(max(32 * 2**20, min(phys_vmem - 16 * 2**20, 110 * 2**20)))

    if block_b is None:
        block_b = _pick_block_b(B, HW, C, const_bytes, dout_pad, vmem_budget)
    assert B % block_b == 0
    assert block_b % 8 == 0 or block_b == B, "output tile needs 8-sublane alignment"
    grid = (B // block_b,)

    def const_spec(shape):
        return pl.BlockSpec(shape, lambda i: (0,) * len(shape),
                            pipeline_mode=pl.Buffered(1))

    out = pl.pallas_call(
        attention_pool_kernel,
        out_shape=jax.ShapeDtypeStruct((B, dout_pad), jnp.float32),
        grid=grid,
        in_specs=[
            pl.BlockSpec((block_b, HW, C), lambda i: (i, 0, 0)),   # tokens (streamed)
            const_spec((C, num_heads)),                            # head mask
            const_spec((num_heads, C)),                            # head mask^T
            const_spec((C, C)),                                    # Wq (scale folded)
            const_spec((C, C)),                                    # Wk
            const_spec((C, C)),                                    # Wv
            const_spec((C, dout_pad)),                             # Wc (lane-padded)
            const_spec((1, C)),                                    # posq
            const_spec((1, C)),                                    # poskm
            const_spec((HW, C)),                                   # posks
            const_spec((1, C)),                                    # posvm
            const_spec((HW, C)),                                   # posvs
            const_spec((1, dout_pad)),                             # bc (lane-padded)
        ],
        out_specs=pl.BlockSpec((block_b, dout_pad), lambda i: (i, 0)),
        compiler_params=pltpu.CompilerParams(
            dimension_semantics=("parallel",),
            vmem_limit_bytes=vmem_budget),
    )(tokens, *consts)
    return out[:, :Dout]


def reference(x_nchw, params, num_heads):
    """Pure-JAX f32 re-implementation of the PyTorch forward (validation)."""
    B, C, H, W = x_nchw.shape
    HW = H * W
    t = jnp.transpose(x_nchw.reshape(B, C, HW), (0, 2, 1))          # (B, HW, C)
    tok = jnp.concatenate([jnp.mean(t, axis=1, keepdims=True), t], axis=1)
    tok = tok + params["pos"][None]
    hd = C // num_heads
    scale = hd ** -0.5
    q = (tok[:, 0:1] @ params["wq"] + params["bq"]) * scale          # (B, 1, C)
    k = tok @ params["wk"] + params["bk"]                            # (B, L, C)
    v = tok @ params["wv"] + params["bv"]
    qh = q.reshape(B, 1, num_heads, hd).transpose(0, 2, 1, 3)
    kh = k.reshape(B, -1, num_heads, hd).transpose(0, 2, 1, 3)
    vh = v.reshape(B, -1, num_heads, hd).transpose(0, 2, 1, 3)
    s = jnp.einsum("bhqd,bhkd->bhqk", qh, kh)
    p = jax.nn.softmax(s, axis=-1)
    o = jnp.einsum("bhqk,bhkd->bhqd", p, vh)
    o = o.transpose(0, 2, 1, 3).reshape(B, 1, C)
    return (o @ params["wc"] + params["bc"]).reshape(B, -1)


def init_params(key, spacial_dim, embed_dim, output_dim):
    L = spacial_dim ** 2 + 1
    ks = jax.random.split(key, 9)
    return {
        "pos": jax.random.normal(ks[0], (L, embed_dim), jnp.float32) / embed_dim ** 0.5,
        "wq": jax.random.normal(ks[1], (embed_dim, embed_dim), jnp.float32) * 0.05,
        "bq": jax.random.normal(ks[2], (1, embed_dim), jnp.float32) * 0.05,
        "wk": jax.random.normal(ks[3], (embed_dim, embed_dim), jnp.float32) * 0.05,
        "bk": jax.random.normal(ks[4], (1, embed_dim), jnp.float32) * 0.05,
        "wv": jax.random.normal(ks[5], (embed_dim, embed_dim), jnp.float32) * 0.05,
        "bv": jax.random.normal(ks[6], (1, embed_dim), jnp.float32) * 0.05,
        "wc": jax.random.normal(ks[7], (embed_dim, output_dim), jnp.float32) * 0.05,
        "bc": jax.random.normal(ks[8], (1, output_dim), jnp.float32) * 0.05,
    }


if __name__ == "__main__":
    B, embed_dim, spacial_dim = 16, 32, 4
    num_heads, output_dim = 4, 64

    key = jax.random.PRNGKey(0)
    k_x, k_p = jax.random.split(key)
    x = jax.random.normal(k_x, (B, embed_dim, spacial_dim, spacial_dim), jnp.float32)
    params = init_params(k_p, spacial_dim, embed_dim, output_dim)

    apply_fn = jax.jit(attention_pool_2d, static_argnames=("num_heads", "block_b"))
    out = jax.block_until_ready(apply_fn(x, params, num_heads=num_heads))

    ref = jax.block_until_ready(reference(x, params, num_heads))
    np.testing.assert_allclose(np.asarray(out), np.asarray(ref), rtol=2e-2, atol=2e-2)
    assert out.shape == (B, output_dim)

    print("KERNEL_OK")
</pallas_src>

<mosaic_0001>
module attributes {stable_mosaic.version = 11 : i64} {
  func.func @attention_pool_kernel(%arg0: i32, %arg1: memref<8x16x32xbf16, #tpu.memory_space<vmem>>, %arg2: memref<32x4xbf16, #tpu.memory_space<vmem>>, %arg3: memref<4x32xbf16, #tpu.memory_space<vmem>>, %arg4: memref<32x32xbf16, #tpu.memory_space<vmem>>, %arg5: memref<32x32xbf16, #tpu.memory_space<vmem>>, %arg6: memref<32x32xbf16, #tpu.memory_space<vmem>>, %arg7: memref<32x128xbf16, #tpu.memory_space<vmem>>, %arg8: memref<1x32xf32, #tpu.memory_space<vmem>>, %arg9: memref<1x32xf32, #tpu.memory_space<vmem>>, %arg10: memref<16x32xf32, #tpu.memory_space<vmem>>, %arg11: memref<1x32xf32, #tpu.memory_space<vmem>>, %arg12: memref<16x32xf32, #tpu.memory_space<vmem>>, %arg13: memref<1x128xf32, #tpu.memory_space<vmem>>, %arg14: memref<8x128xf32, #tpu.memory_space<vmem>>) attributes {dimension_semantics = [#tpu.dimension_semantics<parallel>], iteration_bounds = array<i64: 2>, scalar_prefetch = 0 : i64, scratch_operands = 0 : i64, tpu.core_type = #tpu.core_type<tc>, window_params = [{transform_indices = @transform_0, window_bounds = array<i64: 8, 16, 32>}, {pipeline_mode = #tpu.pipeline_mode<synchronous>, transform_indices = @transform_1, window_bounds = array<i64: 32, 4>}, {pipeline_mode = #tpu.pipeline_mode<synchronous>, transform_indices = @transform_2, window_bounds = array<i64: 4, 32>}, {pipeline_mode = #tpu.pipeline_mode<synchronous>, transform_indices = @transform_3, window_bounds = array<i64: 32, 32>}, {pipeline_mode = #tpu.pipeline_mode<synchronous>, transform_indices = @transform_4, window_bounds = array<i64: 32, 32>}, {pipeline_mode = #tpu.pipeline_mode<synchronous>, transform_indices = @transform_5, window_bounds = array<i64: 32, 32>}, {pipeline_mode = #tpu.pipeline_mode<synchronous>, transform_indices = @transform_6, window_bounds = array<i64: 32, 128>}, {pipeline_mode = #tpu.pipeline_mode<synchronous>, transform_indices = @transform_7, window_bounds = array<i64: 1, 32>}, {pipeline_mode = #tpu.pipeline_mode<synchronous>, transform_indices = @transform_8, window_bounds = array<i64: 1, 32>}, {pipeline_mode = #tpu.pipeline_mode<synchronous>, transform_indices = @transform_9, window_bounds = array<i64: 16, 32>}, {pipeline_mode = #tpu.pipeline_mode<synchronous>, transform_indices = @transform_10, window_bounds = array<i64: 1, 32>}, {pipeline_mode = #tpu.pipeline_mode<synchronous>, transform_indices = @transform_11, window_bounds = array<i64: 16, 32>}, {pipeline_mode = #tpu.pipeline_mode<synchronous>, transform_indices = @transform_12, window_bounds = array<i64: 1, 128>}, {transform_indices = @transform_13, window_bounds = array<i64: 8, 128>}]} {
    %c0 = arith.constant 0 : index
    %c0_0 = arith.constant 0 : index
    %c0_1 = arith.constant 0 : index
    %0 = vector.load %arg1[%c0, %c0_0, %c0_1] : memref<8x16x32xbf16, #tpu.memory_space<vmem>>, vector<8x16x32xbf16>
    %1 = vector.shape_cast %0 : vector<8x16x32xbf16> to vector<128x32xbf16>
    %c0_2 = arith.constant 0 : index
    %c0_3 = arith.constant 0 : index
    %2 = vector.load %arg5[%c0_2, %c0_3] : memref<32x32xbf16, #tpu.memory_space<vmem>>, vector<32x32xbf16>
    %cst = arith.constant dense<0.000000e+00> : vector<128x32xf32>
    %3 = tpu.matmul %1, %2, %cst {dimension_numbers = #tpu.dot_dimension_numbers<[1], [0], [0], [1], [0, 0, 1, 1], [], []>} : vector<128x32xbf16>, vector<32x32xbf16>, vector<128x32xf32> -> vector<128x32xf32>
    %4 = vector.shape_cast %3 : vector<128x32xf32> to vector<8x16x32xf32>
    %c0_4 = arith.constant 0 : index
    %c0_5 = arith.constant 0 : index
    %5 = vector.load %arg6[%c0_4, %c0_5] : memref<32x32xbf16, #tpu.memory_space<vmem>>, vector<32x32xbf16>
    %cst_6 = arith.constant dense<0.000000e+00> : vector<128x32xf32>
    %6 = tpu.matmul %1, %5, %cst_6 {dimension_numbers = #tpu.dot_dimension_numbers<[1], [0], [0], [1], [0, 0, 1, 1], [], []>} : vector<128x32xbf16>, vector<32x32xbf16>, vector<128x32xf32> -> vector<128x32xf32>
    %7 = vector.shape_cast %6 : vector<128x32xf32> to vector<8x16x32xf32>
    %cst_7 = arith.constant dense<0.000000e+00> : vector<8x32xf32>
    %8 = vector.multi_reduction <add>, %4, %cst_7 [1] : vector<8x16x32xf32> to vector<8x32xf32>
    %cst_8 = arith.constant 1.600000e+01 : f32
    %9 = vector.broadcast %cst_8 : f32 to vector<8x32xf32>
    %10 = arith.divf %8, %9 : vector<8x32xf32>
    %c0_9 = arith.constant 0 : index
    %c0_10 = arith.constant 0 : index
    %11 = vector.load %arg9[%c0_9, %c0_10] : memref<1x32xf32, #tpu.memory_space<vmem>>, vector<1x32xf32>
    %12 = vector.broadcast %11 : vector<1x32xf32> to vector<8x32xf32>
    %13 = arith.addf %10, %12 : vector<8x32xf32>
    %cst_11 = arith.constant dense<0.000000e+00> : vector<8x32xf32>
    %14 = vector.multi_reduction <add>, %7, %cst_11 [1] : vector<8x16x32xf32> to vector<8x32xf32>
    %cst_12 = arith.constant 1.600000e+01 : f32
    %15 = vector.broadcast %cst_12 : f32 to vector<8x32xf32>
    %16 = arith.divf %14, %15 : vector<8x32xf32>
    %c0_13 = arith.constant 0 : index
    %c0_14 = arith.constant 0 : index
    %17 = vector.load %arg11[%c0_13, %c0_14] : memref<1x32xf32, #tpu.memory_space<vmem>>, vector<1x32xf32>
    %18 = vector.broadcast %17 : vector<1x32xf32> to vector<8x32xf32>
    %19 = arith.addf %16, %18 : vector<8x32xf32>
    %c0_15 = arith.constant 0 : index
    %c0_16 = arith.constant 0 : index
    %20 = vector.load %arg10[%c0_15, %c0_16] : memref<16x32xf32, #tpu.memory_space<vmem>>, vector<16x32xf32>
    %21 = vector.shape_cast %20 : vector<16x32xf32> to vector<1x16x32xf32>
    %22 = vector.broadcast %21 : vector<1x16x32xf32> to vector<8x16x32xf32>
    %23 = arith.addf %4, %22 : vector<8x16x32xf32>
    %24 = arith.truncf %23 : vector<8x16x32xf32> to vector<8x16x32xbf16>
    %c0_17 = arith.constant 0 : index
    %c0_18 = arith.constant 0 : index
    %25 = vector.load %arg12[%c0_17, %c0_18] : memref<16x32xf32, #tpu.memory_space<vmem>>, vector<16x32xf32>
    %26 = vector.shape_cast %25 : vector<16x32xf32> to vector<1x16x32xf32>
    %27 = vector.broadcast %26 : vector<1x16x32xf32> to vector<8x16x32xf32>
    %28 = arith.addf %7, %27 : vector<8x16x32xf32>
    %29 = arith.truncf %28 : vector<8x16x32xf32> to vector<8x16x32xbf16>
    %30 = arith.extf %0 : vector<8x16x32xbf16> to vector<8x16x32xf32>
    %cst_19 = arith.constant dense<0.000000e+00> : vector<8x32xf32>
    %31 = vector.multi_reduction <add>, %30, %cst_19 [1] : vector<8x16x32xf32> to vector<8x32xf32>
    %cst_20 = arith.constant 1.600000e+01 : f32
    %32 = vector.broadcast %cst_20 : f32 to vector<8x32xf32>
    %33 = arith.divf %31, %32 : vector<8x32xf32>
    %34 = arith.truncf %33 : vector<8x32xf32> to vector<8x32xbf16>
    %c0_21 = arith.constant 0 : index
    %c0_22 = arith.constant 0 : index
    %35 = vector.load %arg4[%c0_21, %c0_22] : memref<32x32xbf16, #tpu.memory_space<vmem>>, vector<32x32xbf16>
    %cst_23 = arith.constant dense<0.000000e+00> : vector<8x32xf32>
    %36 = tpu.matmul %34, %35, %cst_23 {dimension_numbers = #tpu.dot_dimension_numbers<[1], [0], [0], [1], [0, 0, 1, 1], [], []>} : vector<8x32xbf16>, vector<32x32xbf16>, vector<8x32xf32> -> vector<8x32xf32>
    %c0_24 = arith.constant 0 : index
    %c0_25 = arith.constant 0 : index
    %37 = vector.load %arg8[%c0_24, %c0_25] : memref<1x32xf32, #tpu.memory_space<vmem>>, vector<1x32xf32>
    %38 = vector.broadcast %37 : vector<1x32xf32> to vector<8x32xf32>
    %39 = arith.addf %36, %38 : vector<8x32xf32>
    %40 = arith.truncf %39 : vector<8x32xf32> to vector<8x32xbf16>
    %c0_26 = arith.constant 0 : index
    %c0_27 = arith.constant 0 : index
    %41 = vector.load %arg2[%c0_26, %c0_27] : memref<32x4xbf16, #tpu.memory_space<vmem>>, vector<32x4xbf16>
    %42 = vector.shape_cast %40 : vector<8x32xbf16> to vector<8x1x32xbf16>
    %43 = vector.broadcast %42 : vector<8x1x32xbf16> to vector<8x16x32xbf16>
    %44 = arith.mulf %24, %43 : vector<8x16x32xbf16>
    %45 = vector.shape_cast %44 : vector<8x16x32xbf16> to vector<128x32xbf16>
    %cst_28 = arith.constant dense<0.000000e+00> : vector<128x4xf32>
    %46 = tpu.matmul %45, %41, %cst_28 {dimension_numbers = #tpu.dot_dimension_numbers<[1], [0], [0], [1], [0, 0, 1, 1], [], []>} : vector<128x32xbf16>, vector<32x4xbf16>, vector<128x4xf32> -> vector<128x4xf32>
    %47 = vector.shape_cast %46 : vector<128x4xf32> to vector<8x16x4xf32>
    %48 = arith.mulf %13, %39 : vector<8x32xf32>
    %49 = arith.truncf %48 : vector<8x32xf32> to vector<8x32xbf16>
    %cst_29 = arith.constant dense<0.000000e+00> : vector<8x4xf32>
    %50 = tpu.matmul %49, %41, %cst_29 {dimension_numbers = #tpu.dot_dimension_numbers<[1], [0], [0], [1], [0, 0, 1, 1], [], []>} : vector<8x32xbf16>, vector<32x4xbf16>, vector<8x4xf32> -> vector<8x4xf32>
    %cst_30 = arith.constant dense<0xFF800000> : vector<8x4xf32>
    %51 = vector.multi_reduction <maximumf>, %47, %cst_30 [1] : vector<8x16x4xf32> to vector<8x4xf32>
    %52 = arith.maximumf %51, %50 : vector<8x4xf32>
    %53 = vector.shape_cast %52 : vector<8x4xf32> to vector<8x1x4xf32>
    %54 = vector.broadcast %53 : vector<8x1x4xf32> to vector<8x16x4xf32>
    %55 = arith.subf %47, %54 : vector<8x16x4xf32>
    %56 = math.exp %55 : vector<8x16x4xf32>
    %57 = arith.subf %50, %52 : vector<8x4xf32>
    %58 = math.exp %57 : vector<8x4xf32>
    %cst_31 = arith.constant dense<0.000000e+00> : vector<8x4xf32>
    %59 = vector.multi_reduction <add>, %56, %cst_31 [1] : vector<8x16x4xf32> to vector<8x4xf32>
    %60 = arith.addf %59, %58 : vector<8x4xf32>
    %cst_32 = arith.constant 1.000000e+00 : f32
    %61 = vector.broadcast %cst_32 : f32 to vector<8x4xf32>
    %62 = arith.divf %61, %60 : vector<8x4xf32>
    %63 = vector.shape_cast %62 : vector<8x4xf32> to vector<8x1x4xf32>
    %64 = vector.broadcast %63 : vector<8x1x4xf32> to vector<8x16x4xf32>
    %65 = arith.mulf %56, %64 : vector<8x16x4xf32>
    %66 = arith.truncf %65 : vector<8x16x4xf32> to vector<8x16x4xbf16>
    %67 = arith.mulf %58, %62 : vector<8x4xf32>
    %c0_33 = arith.constant 0 : index
    %c0_34 = arith.constant 0 : index
    %68 = vector.load %arg3[%c0_33, %c0_34] : memref<4x32xbf16, #tpu.memory_space<vmem>>, vector<4x32xbf16>
    %69 = vector.shape_cast %66 : vector<8x16x4xbf16> to vector<128x4xbf16>
    %cst_35 = arith.constant dense<0.000000e+00> : vector<128x32xf32>
    %70 = tpu.matmul %69, %68, %cst_35 {dimension_numbers = #tpu.dot_dimension_numbers<[1], [0], [0], [1], [0, 0, 1, 1], [], []>} : vector<128x4xbf16>, vector<4x32xbf16>, vector<128x32xf32> -> vector<128x32xf32>
    %71 = vector.shape_cast %70 : vector<128x32xf32> to vector<8x16x32xf32>
    %72 = arith.truncf %67 : vector<8x4xf32> to vector<8x4xbf16>
    %cst_36 = arith.constant dense<0.000000e+00> : vector<8x32xf32>
    %73 = tpu.matmul %72, %68, %cst_36 {dimension_numbers = #tpu.dot_dimension_numbers<[1], [0], [0], [1], [0, 0, 1, 1], [], []>} : vector<8x4xbf16>, vector<4x32xbf16>, vector<8x32xf32> -> vector<8x32xf32>
    %74 = arith.extf %29 : vector<8x16x32xbf16> to vector<8x16x32xf32>
    %75 = arith.mulf %71, %74 : vector<8x16x32xf32>
    %cst_37 = arith.constant dense<0.000000e+00> : vector<8x32xf32>
    %76 = vector.multi_reduction <add>, %75, %cst_37 [1] : vector<8x16x32xf32> to vector<8x32xf32>
    %77 = arith.mulf %73, %19 : vector<8x32xf32>
    %78 = arith.addf %76, %77 : vector<8x32xf32>
    %79 = arith.truncf %78 : vector<8x32xf32> to vector<8x32xbf16>
    %c0_38 = arith.constant 0 : index
    %c0_39 = arith.constant 0 : index
    %80 = vector.load %arg7[%c0_38, %c0_39] : memref<32x128xbf16, #tpu.memory_space<vmem>>, vector<32x128xbf16>
    %cst_40 = arith.constant dense<0.000000e+00> : vector<8x128xf32>
    %81 = tpu.matmul %79, %80, %cst_40 {dimension_numbers = #tpu.dot_dimension_numbers<[1], [0], [0], [1], [0, 0, 1, 1], [], []>} : vector<8x32xbf16>, vector<32x128xbf16>, vector<8x128xf32> -> vector<8x128xf32>
    %c0_41 = arith.constant 0 : index
    %c0_42 = arith.constant 0 : index
    %82 = vector.load %arg13[%c0_41, %c0_42] : memref<1x128xf32, #tpu.memory_space<vmem>>, vector<1x128xf32>
    %83 = vector.broadcast %82 : vector<1x128xf32> to vector<8x128xf32>
    %84 = arith.addf %81, %83 : vector<8x128xf32>
    %c0_43 = arith.constant 0 : index
    %c0_44 = arith.constant 0 : index
    %85 = vector.load %arg14[%c0_43, %c0_44] : memref<8x128xf32, #tpu.memory_space<vmem>>, vector<8x128xf32>
    tpu.vector_store %arg14[%c0_43, %c0_44], %84 {strides = array<i32>} : memref<8x128xf32, #tpu.memory_space<vmem>>, vector<8x128xf32>,
    return
  }
  func.func @transform_0(%arg0: i32) -> (i32, i32, i32) {
    %c0_i32 = arith.constant 0 : i32
    %c0_i32_0 = arith.constant 0 : i32
    %c0_i32_1 = arith.constant 0 : i32
    return %arg0, %c0_i32, %c0_i32_0 : i32, i32, i32
  }
  func.func @transform_1(%arg0: i32) -> (i32, i32) {
    %c0_i32 = arith.constant 0 : i32
    %c0_i32_0 = arith.constant 0 : i32
    %c0_i32_1 = arith.constant 0 : i32
    return %c0_i32, %c0_i32_0 : i32, i32
  }
  func.func @transform_2(%arg0: i32) -> (i32, i32) {
    %c0_i32 = arith.constant 0 : i32
    %c0_i32_0 = arith.constant 0 : i32
    %c0_i32_1 = arith.constant 0 : i32
    return %c0_i32, %c0_i32_0 : i32, i32
  }
  func.func @transform_3(%arg0: i32) -> (i32, i32) {
    %c0_i32 = arith.constant 0 : i32
    %c0_i32_0 = arith.constant 0 : i32
    %c0_i32_1 = arith.constant 0 : i32
    return %c0_i32, %c0_i32_0 : i32, i32
  }
  func.func @transform_4(%arg0: i32) -> (i32, i32) {
    %c0_i32 = arith.constant 0 : i32
    %c0_i32_0 = arith.constant 0 : i32
    %c0_i32_1 = arith.constant 0 : i32
    return %c0_i32, %c0_i32_0 : i32, i32
  }
  func.func @transform_5(%arg0: i32) -> (i32, i32) {
    %c0_i32 = arith.constant 0 : i32
    %c0_i32_0 = arith.constant 0 : i32
    %c0_i32_1 = arith.constant 0 : i32
    return %c0_i32, %c0_i32_0 : i32, i32
  }
  func.func @transform_6(%arg0: i32) -> (i32, i32) {
    %c0_i32 = arith.constant 0 : i32
    %c0_i32_0 = arith.constant 0 : i32
    %c0_i32_1 = arith.constant 0 : i32
    return %c0_i32, %c0_i32_0 : i32, i32
  }
  func.func @transform_7(%arg0: i32) -> (i32, i32) {
    %c0_i32 = arith.constant 0 : i32
    %c0_i32_0 = arith.constant 0 : i32
    %c0_i32_1 = arith.constant 0 : i32
    return %c0_i32, %c0_i32_0 : i32, i32
  }
  func.func @transform_8(%arg0: i32) -> (i32, i32) {
    %c0_i32 = arith.constant 0 : i32
    %c0_i32_0 = arith.constant 0 : i32
    %c0_i32_1 = arith.constant 0 : i32
    return %c0_i32, %c0_i32_0 : i32, i32
  }
  func.func @transform_9(%arg0: i32) -> (i32, i32) {
    %c0_i32 = arith.constant 0 : i32
    %c0_i32_0 = arith.constant 0 : i32
    %c0_i32_1 = arith.constant 0 : i32
    return %c0_i32, %c0_i32_0 : i32, i32
  }
  func.func @transform_10(%arg0: i32) -> (i32, i32) {
    %c0_i32 = arith.constant 0 : i32
    %c0_i32_0 = arith.constant 0 : i32
    %c0_i32_1 = arith.constant 0 : i32
    return %c0_i32, %c0_i32_0 : i32, i32
  }
  func.func @transform_11(%arg0: i32) -> (i32, i32) {
    %c0_i32 = arith.constant 0 : i32
    %c0_i32_0 = arith.constant 0 : i32
    %c0_i32_1 = arith.constant 0 : i32
    return %c0_i32, %c0_i32_0 : i32, i32
  }
  func.func @transform_12(%arg0: i32) -> (i32, i32) {
    %c0_i32 = arith.constant 0 : i32
    %c0_i32_0 = arith.constant 0 : i32
    %c0_i32_1 = arith.constant 0 : i32
    return %c0_i32, %c0_i32_0 : i32, i32
  }
  func.func @transform_13(%arg0: i32) -> (i32, i32) {
    %c0_i32 = arith.constant 0 : i32
    %c0_i32_0 = arith.constant 0 : i32
    return %arg0, %c0_i32 : i32, i32
  }
}

</mosaic_0001>

<bundles_post_ra>
// kernel: attention_pool_2d.1
= control target key start
LH: loop header
LB: loop body
LE: loop exit
PB: predicated region body
PF: predicated region fallthrough
CT: control target
= control target key end

     0   :  { %s3631_s0 = inlined_call_operand.vmem [shape: bf16[16,16,32], index: 0, kind: input, shape index: {}]   ;;  %s3632_s1 = inlined_call_operand.vmem [shape: bf16[32,4], index: 1, kind: input, shape index: {}]   ;;  %s3633_s2 = inlined_call_operand.vmem [shape: bf16[4,32], index: 2, kind: input, shape index: {}]   ;;  %s3634_s3 = inlined_call_operand.vmem [shape: bf16[32,32], index: 3, kind: input, shape index: {}]   ;;  %s3635_s4 = inlined_call_operand.vmem [shape: bf16[32,32], index: 4, kind: input, shape index: {}]   ;;  %s3636_s5 = inlined_call_operand.vmem [shape: bf16[32,32], index: 5, kind: input, shape index: {}]   ;;  %s3637_s6 = inlined_call_operand.vmem [shape: bf16[32,128], index: 6, kind: input, shape index: {}]   ;;  %s3638_s7 = inlined_call_operand.vmem [shape: f32[1,32], index: 7, kind: input, shape index: {}]   ;;  %s3639_s8 = inlined_call_operand.vmem [shape: f32[1,32], index: 8, kind: input, shape index: {}]   ;;  %s3640_s9 = inlined_call_operand.vmem [shape: f32[16,32], index: 9, kind: input, shape index: {}]   ;;  %s3641_s10 = inlined_call_operand.vmem [shape: f32[1,32], index: 10, kind: input, shape index: {}]   ;;  %s3642_s11 = inlined_call_operand.vmem [shape: f32[16,32], index: 11, kind: input, shape index: {}]   ;;  %s3643_s12 = inlined_call_operand.vmem [shape: f32[1,128], index: 12, kind: input, shape index: {}]   ;;  %s3644_s13 = inlined_call_operand.hbm [shape: f32[16,128], index: 13, kind: output, shape index: {}]  }
   0x1   :  { %3648 = sst [smem:[#allocation6_spill]] %s3631_s0 }
   0x2   :  { %3649 = sst [smem:[#allocation7_spill]] %s3632_s1 }
   0x3   :  { %3650 = sst [smem:[#allocation8_spill]] %s3633_s2 }
   0x4   :  { %3651 = sst [smem:[#allocation9_spill]] %s3634_s3 }
   0x5   :  { %18 = vsyncpa [#allocation3], 0 }
   0x6   :  { %20 = vsyncpa [#allocation3 + $0x1], 0  ;;  %s2696_s25 = smov 0   ;;  %s2698_s26 = smov 0  }
   0x7   :  { %s2700_s27 = smov 0   ;;  %s2702_s28 = smov 0  }
   0x8 LB: > { %s2319_s29 = sadd.s32 4294967295, %s2623_s28   ;;  %s2320_s30 = sadd.s32 4294967294, %s2623_s28   ;;  %s2623_s28 = sphi %s2702_s28, %s3682_s28   ;;  %s2619_s27 = sphi %s2700_s27, %s3681_s27   ;;  %s2615_s26 = sphi %s2698_s26, %s3680_s26   ;;  %s2611_s25 = sphi %s2696_s25, %s3679_s25  }
   0x9   : > { %s2719_s14 = sadd.s32 1, %s2623_s28   ;;  %s311_s15 = sadd.s32 1, %s2619_s27 }
   0xa   : > { %s308_s16 = ssub.s32 %s2623_s28, %s2719_s14  ;;  %p321_p0 = scmp.ne.s32.totalorder %s2619_s27, %s2615_s26 }
   0xb   : > { %p309_p1 = scmp.eq.s32.totalorder %s308_s16, 0  ;;  %p322_p2 = scmp.eq.s32.totalorder %s2319_s29, 1 }
   0xc   : > { %p327_p3 = scmp.ne.s32.totalorder %s2615_s26, %s2611_s25  ;;  %p328_p4 = scmp.eq.s32.totalorder %s2320_s30, 1 }
   0xd   : > { %s2729_s17 = scalar_select %p309_p1, %s2619_s27, %s311_s15  }
   0xe   : > { %p2731_p5 = por %p322_p2, %p321_p0  ;;  %p2735_p6 = por %p328_p4, %p327_p3 }
   0xf   : > { %3652 = sst [smem:[#allocation5_spill]] %s2729_s17  ;;  %p2323_p7 = scmp.ge.s32.totalorder %s2623_s28, 1 }
  0x10   : > { %p392_p8 = scmp.lt.s32.totalorder %s2623_s28, 3 }
  0x12   : > { %p393_p9 = pnand %p2323_p7, %p392_p8 }
  0x13   : > { %s2744_s22 = sshll.u32 (!%p393_p9), %s2319_s29, 3  ;;  %s3655_s3 = sld [smem:[#allocation9_spill]] (!%p393_p9) }
  0x14   : > { %396 = sbr.rel (%p393_p9) target bundleno = 954 (0x3ba), region = 72  ;;  %p438_p10 = scmp.lt.s32.totalorder (!%p393_p9), %s2744_s22, 15 }
  0x15   : > { %s3656_s0 = sld [smem:[#allocation6_spill]] (!%p393_p9)  ;;  %s434_s16 = sand.u32 (!%p393_p9), 1, %s2615_s26  }
  0x16   : > { %s3657_s1 = sld [smem:[#allocation7_spill]] (!%p393_p9)  ;;  %s2324_s20 = sshll.u32 (!%p393_p9), %s434_s16, 3 }
  0x17   : > { %s3658_s2 = sld [smem:[#allocation8_spill]] (!%p393_p9)  ;;  %s2256_s23 = scalar_lea.hbm (!%p393_p9), %s3644_s13, %s2744_s22 }
  0x18   : > { %s436_s15 = scalar_lea.vmem (!%p393_p9), [#allocation2], %s2324_s20 }
  0x19   : > { %v2454_v0 = vld [vmem:[%s3635_s4 + $0x8] sm:$0xff]  ;;  %v2453_v2 = vld [vmem:[%s3635_s4] sm:$0xff]  ;;  %v2625_v3 = vmov 16.0   ;;  %s439_s29 = scalar_select %p438_p10, %s2744_s22, 15  ;;  %vm517_vm0 = vcmask 261120   ;;  %vm1043_vm2 = vcmask 1041409  }
  0x1a   : > { %v2458_v1 = vld [vmem:[%s3655_s3 + $0x8] sm:$0xff]  ;;  %2507 = vrcp.f32 %v2625_v3  ;;  %548 = vmatpush.bf16.msra.mxu0 %v2454_v0  ;;  %v2457_v4 = vld [vmem:[%s3655_s3] sm:$0xff]  ;;  %vm1045_vm3 = vcmask 1042434   ;;  %vm1047_vm4 = vcmask 1043459   ;;  %vm1049_vm5 = vcmask 1044484  }
  0x1b   : > { %1079 = vmatpush.bf16.msra.mxu3 %v2458_v1  ;;  %s2444_s21 = sshll.u32 %s439_s29, 3  ;;  %vm3647_vm6 = vcmask 1045509   ;;  %vm3646_vm7 = vcmask 1046534   ;;  %vm3645_vm8 = vcmask 1047559   ;;  %vm1093_vm9 = vcmask 1040384  }
  0x1c   : > { %s2760_s17 = scalar_lea.vmem %s3656_s0, %s2444_s21  ;;  %vm1423_vm10 = vcmask 31744   ;;  %vm1947_vm11 = vcmask 1041408   ;;  %s2260_s0 = sshll.u32 %s2256_s23, 4  ;;  %s2261_s0 = int_to_ptr.hbm [resolvable:$true] %s2260_s0 }
  0x1d   : > { %v2763_v6 = vld [vmem:[%s2760_s17] sm:$0xff]  ;;  %v447_v8 = vld [vmem:[%s2760_s17 + $0x8] sm:$0xff]   ;;  %v449_v9 = vld [vmem:[%s2760_s17 + $0x10] sm:$0xff]   ;;  %s2581_s21 = scalar_lea.hbm %s3644_s13, 16 }
  0x1e   : > { %549 = vmatpush.bf16.msra.mxu0 %v2453_v2  ;;  %v445_v7 = vld [vmem:[%s2760_s17] sm:$0xff]   ;;  %v451_v10 = vld [vmem:[%s2760_s17 + $0x18] sm:$0xff]   ;;  %v455_v15 = vld [vmem:[%s2760_s17 + $0x28] sm:$0xff]   ;;  %v917_v17 = vunpack.c.l.bf16 %v447_v8  ;;  %v918_v18 = vunpack.c.h.bf16 %v447_v8  ;;  %v919_v19 = vunpack.c.l.bf16 %v449_v9  ;;  %v920_v20 = vunpack.c.h.bf16 %v449_v9 }
  0x1f   : > { %1080 = vmatpush.bf16.msra.mxu3 %v2457_v4  ;;  %v915_v12 = vunpack.c.l.bf16 %v445_v7  ;;  %v916_v13 = vunpack.c.h.bf16 %v445_v7  ;;  %v453_v14 = vld [vmem:[%s2760_s17 + $0x20] sm:$0xff]   ;;  %v457_v16 = vld [vmem:[%s2760_s17 + $0x30] sm:$0xff]   ;;  %v459_v21 = vld [vmem:[%s2760_s17 + $0x38] sm:$0xff]   ;;  %v921_v23 = vunpack.c.l.bf16 %v451_v10  ;;  %v922_v24 = vunpack.c.h.bf16 %v451_v10 }
  0x20   : > { %v2508_v5 = vpop.eup %2507  ;;  %v923_v25 = vunpack.c.l.bf16 %v453_v14  ;;  %v924_v26 = vunpack.c.h.bf16 %v453_v14  ;;  %v925_v27 = vunpack.c.l.bf16 %v455_v15  ;;  %v926_v28 = vunpack.c.h.bf16 %v455_v15  ;;  %v2793_v2 = vld [vmem:[%s2760_s17 + $0x8] sm:$0xff] }
  0x21   : > { %v729_v11 = vmul.f32 16.0, %v2508_v5  ;;  %vm733_vm1 = vweird.f32 %v2508_v5  ;;  %2368 = vmatmul.msk.bf16.vlgmr.msra.gmra.mxu0 %vm517_vm0, %v2763_v6  ;;  %v927_v29 = vunpack.c.l.bf16 %v457_v16  ;;  %v928_v31 = vunpack.c.h.bf16 %v457_v16 }
  0x22   : > { %v929_v32 = vunpack.c.l.bf16 %v459_v21  ;;  %v930_v33 = vunpack.c.h.bf16 %v459_v21  ;;  %v931_v34 = vsel %vm517_vm0, %v915_v12, 0.0  ;;  %v932_v35 = vsel %vm517_vm0, %v916_v13, 0.0 }
  0x23   : > { %v730_v22 = vsub.f32 1.0, %v729_v11  ;;  %v940_v36 = vsel %vm517_vm0, %v917_v17, 0.0  ;;  %v941_v37 = vsel %vm517_vm0, %v918_v18, 0.0  ;;  %v933_v39 = vadd.f32 %v932_v35, %v931_v34 }
  0x24   : > { %v942_v40 = vadd.f32 %v941_v37, %v940_v36  ;;  %v949_v41 = vsel %vm517_vm0, %v919_v19, 0.0  ;;  %v950_v42 = vsel %vm517_vm0, %v920_v20, 0.0  ;;  %v958_v43 = vsel %vm517_vm0, %v921_v23, 0.0 }
  0x25   : > { %v731_v30 = vmul.f32 %v2508_v5, %v730_v22  ;;  %v959_v44 = vsel %vm517_vm0, %v922_v24, 0.0  ;;  %v967_v45 = vsel %vm517_vm0, %v923_v25, 0.0  ;;  %v934_v47 = vrot.slane %v933_v39, 4 }
  0x26   : > { %v943_v48 = vrot.slane %v942_v40, 4  ;;  %v951_v49 = vadd.f32 %v950_v42, %v949_v41  ;;  %v960_v50 = vadd.f32 %v959_v44, %v958_v43  ;;  %v968_v51 = vsel %vm517_vm0, %v924_v26, 0.0 }
  0x27   : > { %v732_v38 = vadd.f32 %v2508_v5, %v731_v30  ;;  %v976_v52 = vsel %vm517_vm0, %v925_v27, 0.0  ;;  %v977_v53 = vsel %vm517_vm0, %v926_v28, 0.0  ;;  %v935_v54 = vadd.f32 %v934_v47, %v933_v39 }
  0x28   : > { %v944_v55 = vadd.f32 %v943_v48, %v942_v40  ;;  %v952_v56 = vrot.slane %v951_v49, 4  ;;  %v969_v57 = vadd.f32 %v968_v51, %v967_v45  ;;  %v961_v58 = vrot.slane %v960_v50, 4 }
  0x29   : > { %v2785_v46 = vsel %vm733_vm1, %v2508_v5, %v732_v38  ;;  %v978_v59 = vadd.f32 %v977_v53, %v976_v52  ;;  %v985_v60 = vsel %vm517_vm0, %v927_v29, 0.0  ;;  %v986_v61 = vsel %vm517_vm0, %v928_v31, 0.0 }
  0x2a   : > { %v936_v62 = vrot.slane %v935_v54, 2  ;;  %v945_v63 = vrot.slane %v944_v55, 2  ;;  %v953_v0 = vadd.f32 %v952_v56, %v951_v49  ;;  %v970_v1 = vrot.slane %v969_v57, 4 }
  0x2b   : > { %v962_v3 = vadd.f32 %v961_v58, %v960_v50  ;;  %v979_v4 = vrot.slane %v978_v59, 4  ;;  %v987_v5 = vadd.f32 %v986_v61, %v985_v60  ;;  %v994_v7 = vsel %vm517_vm0, %v929_v32, 0.0 }
  0x2c   : > { %v937_v8 = vadd.f32 %v936_v62, %v935_v54  ;;  %v946_v9 = vadd.f32 %v945_v63, %v944_v55  ;;  %v954_v10 = vrot.slane %v953_v0, 2  ;;  %v971_v11 = vadd.f32 %v970_v1, %v969_v57 }
  0x2d   : > { %v963_v12 = vrot.slane %v962_v3, 2  ;;  %v980_v13 = vadd.f32 %v979_v4, %v978_v59  ;;  %v988_v14 = vrot.slane %v987_v5, 4  ;;  %v995_v15 = vsel %vm517_vm0, %v930_v33, 0.0 }
  0x2e   : > { %v938_v16 = vrot.slane %v937_v8, 1  ;;  %v947_v17 = vrot.slane %v946_v9, 1  ;;  %v955_v18 = vadd.f32 %v954_v10, %v953_v0  ;;  %v972_v19 = vrot.slane %v971_v11, 2 }
  0x2f   : > { %v964_v20 = vadd.f32 %v963_v12, %v962_v3  ;;  %v981_v21 = vrot.slane %v980_v13, 2  ;;  %v989_v22 = vadd.f32 %v988_v14, %v987_v5  ;;  %v996_v23 = vadd.f32 %v995_v15, %v994_v7 }
  0x30   : > { %v939_v24 = vadd.f32 %v938_v16, %v937_v8  ;;  %v948_v25 = vadd.f32 %v947_v17, %v946_v9  ;;  %v956_v26 = vrot.slane %v955_v18, 1  ;;  %v973_v27 = vadd.f32 %v972_v19, %v971_v11  ;;  %v2810_v8 = vld [vmem:[%s2760_s17 + $0x10] sm:$0xff]  ;;  %v2826_v19 = vld [vmem:[%s2760_s17 + $0x20] sm:$0xff] }
  0x31   : > { %2369 = vmatmul.msk.bf16.gmra.mxu0 %vm517_vm0, %v2793_v2  ;;  %v965_v28 = vrot.slane %v964_v20, 1  ;;  %v982_v29 = vadd.f32 %v981_v21, %v980_v13  ;;  %v990_v30 = vrot.slane %v989_v22, 2  ;;  %v997_v31 = vrot.slane %v996_v23, 4  ;;  %v2451_v21 = vld [vmem:[%s2760_s17 + $0x30] sm:$0xff] }
  0x32   : > { %v957_v32 = vadd.f32 %v956_v26, %v955_v18  ;;  %v974_v33 = vrot.slane %v973_v27, 1  ;;  %v1003_v34 = vmul.f32 %v939_v24, %v2785_v46  ;;  %v1004_v35 = vmul.f32 %v948_v25, %v2785_v46  ;;  %v2821_v18 = vld [vmem:[%s2760_s17 + $0x18] sm:$0xff] }
  0x33   : > { %v966_v36 = vadd.f32 %v965_v28, %v964_v20  ;;  %v983_v37 = vrot.slane %v982_v29, 1  ;;  %v991_v38 = vadd.f32 %v990_v30, %v989_v22  ;;  %v998_v39 = vadd.f32 %v997_v31, %v996_v23  ;;  %v2831_v20 = vld [vmem:[%s2760_s17 + $0x28] sm:$0xff]  ;;  %v2452_v22 = vld [vmem:[%s2760_s17 + $0x38] sm:$0xff] }
  0x34   : > { %v975_v40 = vadd.f32 %v974_v33, %v973_v27  ;;  %v1005_v41 = vmul.f32 %v957_v32, %v2785_v46  ;;  %v1011_v42 = vpack.c.bf16 %v1003_v34, %v1003_v34  ;;  %v1012_v43 = vpack.c.bf16 %v1004_v35, %v1004_v35 }
  0x35   : > { %v984_v44 = vadd.f32 %v983_v37, %v982_v29  ;;  %v992_v45 = vrot.slane %v991_v38, 1  ;;  %v999_v47 = vrot.slane %v998_v39, 2  ;;  %v1006_v48 = vmul.f32 %v966_v36, %v2785_v46 }
  0x36   : > { %v1007_v49 = vmul.f32 %v975_v40, %v2785_v46  ;;  %v1013_v50 = vpack.c.bf16 %v1005_v41, %v1005_v41  ;;  %v1035_v51 = vunpack.c.l.b16 %v1011_v42  ;;  %v1036_v52 = vunpack.c.l.b16 %v1012_v43  ;;  %v2459_v43 = vld [vmem:[%s3657_s1] sm:$0xff] }
  0x37   : > { %v993_v53 = vadd.f32 %v992_v45, %v991_v38  ;;  %v1000_v54 = vadd.f32 %v999_v47, %v998_v39  ;;  %v1008_v55 = vmul.f32 %v984_v44, %v2785_v46  ;;  %v1014_v56 = vpack.c.bf16 %v1006_v48, %v1006_v48  ;;  %v2460_v38 = vld [vmem:[%s3657_s1 + $0x8] sm:$0xff]  ;;  %s2246_s1 = scalar_lea.sflag [#allocation3], %s434_s16 }
  0x38   : > { %v1015_v57 = vpack.c.bf16 %v1007_v49, %v1007_v49  ;;  %v1037_v58 = vunpack.c.l.b16 %v1013_v50  ;;  %v1044_v59 = vsel %vm1043_vm2, %v1036_v52, %v1035_v51  ;;  %1301 = vmatpush.bf16.msrb.mxu3 %v2460_v38  ;;  %1416 = vmatpush.bf16.msra.mxu2 %v2460_v38  ;;  %v2504_v52 = vld [vmem:[%s3638_s7] ss:$0 sm:$0xff] }
  0x39   : > { %v1001_v60 = vrot.slane %v1000_v54, 1  ;;  %v1009_v61 = vmul.f32 %v993_v53, %v2785_v46  ;;  %v1016_v62 = vpack.c.bf16 %v1008_v55, %v1008_v55  ;;  %v1038_v63 = vunpack.c.l.b16 %v1014_v56  ;;  %v2870_v55 = vld [vmem:[%s3639_s8] ss:$0 sm:$0xff] }
  0x3a   : > { %v1039_v0 = vunpack.c.l.b16 %v1015_v57  ;;  %v1046_v1 = vsel %vm1045_vm3, %v1037_v58, %v1044_v59 }
  0x3b   : > { %v1002_v3 = vadd.f32 %v1001_v60, %v1000_v54  ;;  %v1017_v4 = vpack.c.bf16 %v1009_v61, %v1009_v61  ;;  %v1040_v5 = vunpack.c.l.b16 %v1016_v62  ;;  %v1048_v7 = vsel %vm1047_vm4, %v1038_v63, %v1046_v1 }
  0x3c   : > { %v1050_v9 = vsel %vm1049_vm5, %v1039_v0, %v1048_v7  ;;  %1302 = vmatpush.bf16.msrb.mxu3 %v2459_v43  ;;  %1417 = vmatpush.bf16.msra.mxu2 %v2459_v43 }
  0x3d   : > { %v1010_v10 = vmul.f32 %v1002_v3, %v2785_v46  ;;  %v1041_v11 = vunpack.c.l.b16 %v1017_v4  ;;  %v1052_v12 = vsel %vm3647_vm6, %v1040_v5, %v1050_v9  ;;  %v2887_v4 = vld [vmem:[%s3640_s9] sm:$0xff]  ;;  %v2892_v5 = vld [vmem:[%s3640_s9 + $0x8] sm:$0xff] }
  0x3f   : > { %v1018_v13 = vpack.c.bf16 %v1010_v10, %v1010_v10  ;;  %v1054_v14 = vsel %vm3646_vm7, %v1041_v11, %v1052_v12 }
  0x41   : > { %2370 = vmatmul.msk.bf16.gmra.mxu0 %vm517_vm0, %v2810_v8  ;;  %v1042_v15 = vunpack.c.l.b16 %v1018_v13 }
  0x43   : > { %v1056_v16 = vsel %vm3645_vm8, %v1042_v15, %v1054_v14 }
  0x44   : > { %v1057_v17 = vpack.c.b16 %v1056_v16, %v1056_v16 }
  0x46   : > { %2400 = vmatmul.msk.bf16.vlgmr.msra.gmra.mxu3 %vm517_vm0, %v1057_v17 }
  0x51   : > { %2371 = vmatmul.msk.bf16.gmra.mxu0 %vm517_vm0, %v2821_v18 }
  0x61   : > { %2372 = vmatmul.msk.bf16.gmra.mxu0 %vm517_vm0, %v2826_v19 }
  0x71   : > { %2373 = vmatmul.msk.bf16.gmra.mxu0 %vm517_vm0, %v2831_v20 }
  0x81   : > { %2374 = vmatmul.msk.bf16.gmra.mxu0 %vm517_vm0, %v2451_v21 }
  0x91   : > { %2375 = vmatmul.msk.bf16.gmra.mxu0 %vm517_vm0, %v2452_v22 }
  0x9e   : > { %v551_v23 = vpop.f32.mrf.mxu0 }
  0x9f   : > { %v656_v24 = vsel %vm517_vm0, %v551_v23, 0.0  ;;  %v849_v14 = vadd.f32 %v2887_v4, %v551_v23 }
  0xa6   : > { %v553_v25 = vpop.f32.mrf.mxu0 }
  0xa7   : > { %v657_v26 = vsel %vm517_vm0, %v553_v25, 0.0  ;;  %v850_v15 = vadd.f32 %v2892_v5, %v553_v25 }
  0xa8   : > { %v658_v27 = vadd.f32 %v657_v26, %v656_v24 }
  0xa9   : > { %v866_v25 = vpack.c.bf16 %v850_v15, %v850_v15 }
  0xaa   : > { %v659_v29 = vrot.slane %v658_v27, 4 }
  0xac   : > { %v660_v30 = vadd.f32 %v659_v29, %v658_v27 }
  0xae   : > { %v2841_v28 = vpop.f32.mrf.mxu0  ;;  %v661_v35 = vrot.slane %v660_v30, 2 }
  0xaf   : > { %v665_v31 = vsel %vm517_vm0, %v2841_v28, 0.0 }
  0xb0   : > { %v662_v39 = vadd.f32 %v661_v35, %v660_v30 }
  0xb2   : > { %v663_v44 = vrot.slane %v662_v39, 1 }
  0xb4   : > { %v664_v47 = vadd.f32 %v663_v44, %v662_v39  ;;  %v1164_v44 = vunpack.c.l.bf16 %v866_v25 }
  0xb6   : > { %v2845_v32 = vpop.f32.mrf.mxu0  ;;  %v735_v54 = vmul.f32 %v2785_v46, %v664_v47 }
  0xb7   : > { %v666_v33 = vsel %vm517_vm0, %v2845_v32, 0.0  ;;  %v852_v47 = vadd.f32 %v2892_v5, %v2845_v32 }
  0xb8   : > { %v667_v34 = vadd.f32 %v666_v33, %v665_v31  ;;  %v747_v61 = vadd.f32 %v2870_v55, %v735_v54  ;;  %v865_v31 = vpack.c.bf16 %v849_v14, %v849_v14 }
  0xba   : > { %v668_v36 = vrot.slane %v667_v34, 4  ;;  %v1163_v43 = vunpack.c.l.bf16 %v865_v31 }
  0xbc   : > { %v669_v37 = vadd.f32 %v668_v36, %v667_v34 }
  0xbe   : > { %v670_v40 = vrot.slane %v669_v37, 2  ;;  %v2852_v41 = vpop.f32.mrf.mxu0 }
  0xbf   : > { %v674_v49 = vsel %vm517_vm0, %v2852_v41, 0.0 }
  0xc0   : > { %v671_v42 = vadd.f32 %v670_v40, %v669_v37 }
  0xc2   : > { %v672_v45 = vrot.slane %v671_v42, 1 }
  0xc4   : > { %v673_v48 = vadd.f32 %v672_v45, %v671_v42  ;;  %v851_v45 = vadd.f32 %v2887_v4, %v2841_v28 }
  0xc6   : > { %v2859_v50 = vpop.f32.mrf.mxu0  ;;  %v736_v56 = vmul.f32 %v2785_v46, %v673_v48 }
  0xc7   : > { %v675_v51 = vsel %vm517_vm0, %v2859_v50, 0.0 }
  0xc8   : > { %v676_v53 = vadd.f32 %v675_v51, %v674_v49  ;;  %v748_v62 = vadd.f32 %v2870_v55, %v736_v56 }
  0xc9   : > { %v1082_v58 = vpop.f32.mrf.mxu3 }
  0xca   : > { %v677_v57 = vrot.slane %v676_v53, 4  ;;  %v2873_v59 = vadd.f32 %v2504_v52, %v1082_v58  ;;  %v867_v58 = vpack.c.bf16 %v851_v45, %v851_v45 }
  0xcc   : > { %v678_v60 = vadd.f32 %v677_v57, %v676_v53  ;;  %v2879_v0 = vpack.c.bf16 %v2873_v59, %v2873_v59  ;;  %v1345_v3 = vrot.slane %v2873_v59, 1  ;;  %v2898_v10 = vmul.f32 %v2873_v59, %v747_v61 }
  0xcd   : > { %v1346_v35 = vrot.slane %v2873_v59, 2 }
  0xce   : > { %v679_v63 = vrot.slane %v678_v60, 2  ;;  %v2881_v1 = vpop.f32.mrf.mxu0  ;;  %v2895_v9 = vrot.slane %v2879_v0, 3  ;;  %v2900_v11 = vmul.f32 %v1345_v3, %v748_v62 }
  0xcf   : > { %v683_v26 = vsel %vm517_vm0, %v2881_v1, 0.0 }
  0xd0   : > { %v680_v7 = vadd.f32 %v679_v63, %v678_v60  ;;  %v1096_v13 = vsel %vm1093_vm9, %v2879_v0, %v2895_v9  ;;  %v2909_v24 = vsel %vm1047_vm4, %v2879_v0, %v2895_v9  ;;  %v1098_v48 = vsel %vm1043_vm2, %v2879_v0, %v2895_v9 }
  0xd1   : > { %v1084_v16 = vpop.f32.mrf.mxu3  ;;  %v2401_v17 = vpack.i.b16 %v1096_v13, %v1096_v13  ;;  %v1108_v22 = vunpack.i.h.s16 %v1096_v13  ;;  %v868_v60 = vpack.c.bf16 %v852_v47, %v852_v47  ;;  %v2929_v61 = vrot.slane %v1098_v48, 1 }
  0xd2   : > { %v681_v12 = vrot.slane %v680_v7, 1  ;;  %v1165_v13 = vunpack.c.l.bf16 %v867_v58 }
  0xd3   : > { %v1123_v27 = vperm.slane %v2401_v17, 0  ;;  %v1116_v23 = vpack.i.b16 %v1108_v22, %v1108_v22  ;;  %v2402_v14 = vpack.i.b16 %v2929_v61, %v2929_v61  ;;  %v1166_v15 = vunpack.c.l.bf16 %v868_v60 }
  0xd4   : > { %v682_v21 = vadd.f32 %v681_v12, %v680_v7 }
  0xd5   : > { %v1132_v37 = vpack.i.b16 %v1123_v27, %v1123_v27  ;;  %v1124_v38 = vperm.slane %v1116_v23, 0  ;;  %v1347_v23 = vrot.slane %v2873_v59, 3 }
  0xd6   : > { %v737_v29 = vmul.f32 %v2785_v46, %v682_v21  ;;  %v2914_v30 = vpop.f32.mrf.mxu0 }
  0xd7   : > { %v684_v33 = vsel %vm517_vm0, %v2914_v30, 0.0  ;;  %v1134_v42 = vperm.slane %v1132_v37, 0  ;;  %v1136_v52 = vpack.i.b16 %v1124_v38, %v1124_v38 }
  0xd8   : > { %v749_v34 = vadd.f32 %v2870_v55, %v737_v29  ;;  %v685_v36 = vadd.f32 %v684_v33, %v683_v26  ;;  %v1125_v29 = vperm.slane %v2402_v14, 0 }
  0xd9   : > { %v1179_v51 = vunpack.c.l.bf16 %v1134_v42  ;;  %v1138_v32 = vperm.slane %v1136_v52, 0  ;;  %v854_v42 = vadd.f32 %v2892_v5, %v2859_v50 }
  0xda   : > { %v1362_v39 = vmul.f32 %v1346_v35, %v749_v34  ;;  %v686_v40 = vrot.slane %v685_v36, 4 }
  0xdb   : > { %v1187_v54 = vmul.f32 %v1179_v51, %v1163_v43  ;;  %v1188_v56 = vmul.f32 %v1179_v51, %v1164_v44  ;;  %v1180_v21 = vunpack.c.l.bf16 %v1138_v32  ;;  %v1140_v43 = vpack.i.b16 %v1125_v29, %v1125_v29 }
  0xdc   : > { %v687_v49 = vadd.f32 %v686_v40, %v685_v36  ;;  %v1370_v36 = vpack.c.bf16 %v1362_v39, %v1362_v39  ;;  %v853_v40 = vadd.f32 %v2887_v4, %v2852_v41  ;;  %v1369_v51 = vpack.c.bf16 %v2900_v11, %v2900_v11 }
  0xdd   : > { %v1203_v62 = vpack.c.bf16 %v1187_v54, %v1187_v54  ;;  %v1204_v63 = vpack.c.bf16 %v1188_v56, %v1188_v56  ;;  %v1189_v34 = vmul.f32 %v1180_v21, %v1165_v13  ;;  %v1190_v35 = vmul.f32 %v1180_v21, %v1166_v15 }
  0xde   : > { %v688_v53 = vrot.slane %v687_v49, 2  ;;  %v2927_v57 = vpop.f32.mrf.mxu0  ;;  %v1368_v54 = vpack.c.bf16 %v2898_v10, %v2898_v10  ;;  %v869_v41 = vpack.c.bf16 %v853_v40, %v853_v40  ;;  %v870_v56 = vpack.c.bf16 %v854_v42, %v854_v42 }
  0xdf   : > { %v1235_v7 = vunpack.c.l.b16 %v1203_v62  ;;  %v1236_v12 = vunpack.c.l.b16 %v1204_v63  ;;  %v692_v22 = vsel %vm517_vm0, %v2927_v57, 0.0  ;;  %v1205_v47 = vpack.c.bf16 %v1189_v34, %v1189_v34 }
  0xe0   : > { %v689_v28 = vadd.f32 %v688_v53, %v687_v49  ;;  %v1206_v48 = vpack.c.bf16 %v1190_v35, %v1190_v35  ;;  %v1386_v49 = vunpack.c.l.b16 %v1370_v36  ;;  %v1142_v58 = vperm.slane %v1140_v43, 0 }
  0xe1   : > { %v1251_v17 = vpack.c.b16 %v1236_v12, %v1235_v7  ;;  %v1237_v60 = vunpack.c.l.b16 %v1205_v47  ;;  %v1385_v62 = vunpack.c.l.b16 %v1369_v51  ;;  %v1110_v32 = vunpack.i.h.s16 %v2929_v61 }
  0xe2   : > { %v690_v3 = vrot.slane %v689_v28, 1  ;;  %v1394_v63 = vrot.slane %v1386_v49, 6  ;;  %v1384_v11 = vunpack.c.l.b16 %v1368_v54  ;;  %v1167_v13 = vunpack.c.l.bf16 %v869_v41 }
  0xe3   : > { %2413 = vmatmul.msk.bf16.vlgmr.msrb.gmra.mxu3 %vm517_vm0, %v1251_v17  ;;  %v1392_v12 = vrot.slane %v1385_v62, 7  ;;  %v1168_v14 = vunpack.c.l.bf16 %v870_v56  ;;  %v1181_v15 = vunpack.c.l.bf16 %v1142_v58  ;;  %v856_v42 = vadd.f32 %v2892_v5, %v2914_v30 }
  0xe4   : > { %v691_v16 = vadd.f32 %v690_v3, %v689_v28  ;;  %v1238_v28 = vunpack.c.l.b16 %v1206_v48  ;;  %v855_v48 = vadd.f32 %v2887_v4, %v2881_v1  ;;  %v1101_v54 = vsel %vm1045_vm3, %v2879_v0, %v2895_v9 }
  0xe5   : > { %v1393_v10 = vsel %vm1043_vm2, %v1392_v12, %v1384_v11  ;;  %v1191_v36 = vmul.f32 %v1181_v15, %v1167_v13 }
  0xe6   : > { %v738_v26 = vmul.f32 %v2785_v46, %v691_v16  ;;  %v2937_v27 = vpop.f32.mrf.mxu0  ;;  %v1252_v17 = vpack.c.b16 %v1238_v28, %v1237_v60  ;;  %v1103_v28 = vrot.slane %v1101_v54, 2 }
  0xe7   : > { %v693_v31 = vsel %vm517_vm0, %v2937_v27, 0.0  ;;  %v1207_v47 = vpack.c.bf16 %v1191_v36, %v1191_v36 }
  0xe8   : > { %v750_v25 = vadd.f32 %v2870_v55, %v738_v26  ;;  %v694_v33 = vadd.f32 %v693_v31, %v692_v22  ;;  %v1395_v22 = vsel %vm1045_vm3, %v1394_v63, %v1393_v10  ;;  %v1118_v26 = vpack.i.b16 %v1110_v32, %v1110_v32 }
  0xe9   : > { %v1348_v31 = vrot.slane %v2873_v59, 4  ;;  %v1239_v30 = vunpack.c.l.b16 %v1207_v47  ;;  %v2403_v13 = vpack.i.b16 %v1103_v28, %v1103_v28  ;;  %v1112_v47 = vunpack.i.h.s16 %v1103_v28 }
  0xea   : > { %v1363_v37 = vmul.f32 %v1347_v23, %v750_v25  ;;  %v695_v38 = vrot.slane %v694_v33, 4 }
  0xec   : > { %v1371_v44 = vpack.c.bf16 %v1363_v37, %v1363_v37  ;;  %v696_v45 = vadd.f32 %v695_v38, %v694_v33  ;;  %v1192_v33 = vmul.f32 %v1181_v15, %v1168_v14  ;;  %v1126_v37 = vperm.slane %v1118_v26, 0 }
  0xed   : > { %v1127_v26 = vperm.slane %v2403_v13, 0 }
  0xee   : > { %v1387_v52 = vunpack.c.l.b16 %v1371_v44  ;;  %v697_v53 = vrot.slane %v696_v45, 2  ;;  %v2949_v39 = vpop.f32.mrf.mxu0  ;;  %v1208_v43 = vpack.c.bf16 %v1192_v33, %v1192_v33  ;;  %v1144_v49 = vpack.i.b16 %v1126_v37, %v1126_v37 }
  0xef   : > { %v701_v21 = vsel %vm517_vm0, %v2949_v39, 0.0  ;;  %v858_v33 = vadd.f32 %v2892_v5, %v2937_v27  ;;  %v1148_v36 = vpack.i.b16 %v1127_v26, %v1127_v26 }
  0xf0   : > { %v698_v50 = vadd.f32 %v697_v53, %v696_v45  ;;  %v1396_v3 = vrot.slane %v1387_v52, 5  ;;  %v872_v53 = vpack.c.bf16 %v856_v42, %v856_v42  ;;  %v1240_v41 = vunpack.c.l.b16 %v1208_v43 }
  0xf1   : > { %v1146_v60 = vperm.slane %v1144_v49, 0  ;;  %v874_v43 = vpack.c.bf16 %v858_v33, %v858_v33  ;;  %v1150_v49 = vperm.slane %v1148_v36, 0 }
  0xf2   : > { %v699_v7 = vrot.slane %v698_v50, 1  ;;  %v1397_v23 = vsel %vm1047_vm4, %v1396_v3, %v1395_v22  ;;  %v1170_v63 = vunpack.c.l.bf16 %v872_v53  ;;  %v1253_v1 = vpack.c.b16 %v1240_v41, %v1239_v30 }
  0xf3   : > { %2414 = vmatmul.msk.bf16.gmra.mxu3 %vm517_vm0, %v1252_v17  ;;  %v1182_v12 = vunpack.c.l.bf16 %v1146_v60  ;;  %v1172_v27 = vunpack.c.l.bf16 %v874_v43  ;;  %v1183_v30 = vunpack.c.l.bf16 %v1150_v49 }
  0xf4   : > { %v700_v16 = vadd.f32 %v699_v7, %v698_v50  ;;  %v871_v50 = vpack.c.bf16 %v855_v48, %v855_v48 }
  0xf6   : > { %v739_v29 = vmul.f32 %v2785_v46, %v700_v16  ;;  %v2960_v61 = vpop.f32.mrf.mxu0  ;;  %v1169_v7 = vunpack.c.l.bf16 %v871_v50  ;;  %v1194_v16 = vmul.f32 %v1182_v12, %v1170_v63  ;;  %v1120_v50 = vpack.i.b16 %v1112_v47, %v1112_v47 }
  0xf7   : > { %v702_v25 = vsel %vm517_vm0, %v2960_v61, 0.0 }
  0xf8   : > { %v751_v34 = vadd.f32 %v2870_v55, %v739_v29  ;;  %v703_v35 = vadd.f32 %v702_v25, %v701_v21  ;;  %v1349_v21 = vrot.slane %v2873_v59, 5  ;;  %v1193_v22 = vmul.f32 %v1182_v12, %v1169_v7 }
  0xf9   : > { %v1210_v25 = vpack.c.bf16 %v1194_v16, %v1194_v16  ;;  %v1350_v7 = vrot.slane %v2873_v59, 6  ;;  %v1128_v12 = vperm.slane %v1120_v50, 0  ;;  %v860_v16 = vadd.f32 %v2892_v5, %v2960_v61 }
  0xfa   : > { %v1364_v38 = vmul.f32 %v1348_v31, %v751_v34  ;;  %v704_v40 = vrot.slane %v703_v35, 4 }
  0xfb   : > { %v1242_v42 = vunpack.c.l.b16 %v1210_v25  ;;  %v876_v25 = vpack.c.bf16 %v860_v16, %v860_v16 }
  0xfc   : > { %v1372_v44 = vpack.c.bf16 %v1364_v38, %v1364_v38  ;;  %v705_v45 = vadd.f32 %v704_v40, %v703_v35  ;;  %v1209_v35 = vpack.c.bf16 %v1193_v22, %v1193_v22  ;;  %v1152_v22 = vpack.i.b16 %v1128_v12, %v1128_v12 }
  0xfe   : > { %v706_v51 = vrot.slane %v705_v45, 2  ;;  %v2971_v52 = vpop.f32.mrf.mxu0  ;;  %v1388_v56 = vunpack.c.l.b16 %v1372_v44  ;;  %v1241_v48 = vunpack.c.l.b16 %v1209_v35  ;;  %v1106_v35 = vrot.slane %v2909_v24, 3 }
  0xff   : > { %v710_v11 = vsel %vm517_vm0, %v2971_v52, 0.0  ;;  %v1351_v24 = vrot.slane %v2873_v59, 7 }
 0x100   : > { %v707_v58 = vadd.f32 %v706_v51, %v705_v45  ;;  %v1398_v3 = vrot.slane %v1388_v56, 4  ;;  %v1254_v41 = vpack.c.b16 %v1242_v42, %v1241_v48  ;;  %v1174_v42 = vunpack.c.l.bf16 %v876_v25 }
 0x101   : > { %v2404_v47 = vpack.i.b16 %v1106_v35, %v1106_v35 }
 0x102   : > { %v708_v62 = vrot.slane %v707_v58, 1  ;;  %v1399_v14 = vsel %vm1049_vm5, %v1398_v3, %v1397_v23  ;;  %v857_v23 = vadd.f32 %v2887_v4, %v2927_v57 }
 0x103   : > { %2415 = vmatmul.msk.bf16.gmra.mxu3 %vm517_vm0, %v1253_v1 }
 0x104   : > { %v709_v32 = vadd.f32 %v708_v62, %v707_v58  ;;  %v873_v45 = vpack.c.bf16 %v857_v23, %v857_v23 }
 0x106   : > { %v740_v0 = vmul.f32 %v2785_v46, %v709_v32  ;;  %v2980_v9 = vpop.f32.mrf.mxu0  ;;  %v1171_v57 = vunpack.c.l.bf16 %v873_v45  ;;  %v1196_v32 = vmul.f32 %v1183_v30, %v1172_v27  ;;  %v1129_v27 = vperm.slane %v2404_v47, 0 }
 0x107   : > { %v711_v15 = vsel %vm517_vm0, %v2980_v9, 0.0 }
 0x108   : > { %v752_v17 = vadd.f32 %v2870_v55, %v740_v0  ;;  %v712_v10 = vadd.f32 %v711_v15, %v710_v11  ;;  %v1195_v11 = vmul.f32 %v1183_v30, %v1171_v57  ;;  %v1212_v15 = vpack.c.bf16 %v1196_v32, %v1196_v32 }
 0x109   : > { %v861_v30 = vadd.f32 %v2887_v4, %v2971_v52  ;;  %v1156_v50 = vpack.i.b16 %v1129_v27, %v1129_v27 }
 0x10a   : > { %v713_v29 = vrot.slane %v712_v10, 4  ;;  %v1365_v31 = vmul.f32 %v1349_v21, %v752_v17  ;;  %v859_v21 = vadd.f32 %v2887_v4, %v2949_v39 }
 0x10b   : > { %v877_v59 = vpack.c.bf16 %v861_v30, %v861_v30 }
 0x10c   : > { %v714_v34 = vadd.f32 %v713_v29, %v712_v10  ;;  %v1373_v40 = vpack.c.bf16 %v1365_v31, %v1365_v31  ;;  %v1244_v31 = vunpack.c.l.b16 %v1212_v15  ;;  %v875_v36 = vpack.c.bf16 %v859_v21, %v859_v21 }
 0x10e   : > { %v715_v37 = vrot.slane %v714_v34, 2  ;;  %v2991_v38 = vpop.f32.mrf.mxu0  ;;  %v1389_v53 = vunpack.c.l.b16 %v1373_v40  ;;  %v1173_v45 = vunpack.c.l.bf16 %v875_v36 }
 0x10f   : > { %v719_v58 = vsel %vm517_vm0, %v2991_v38, 0.0 }
 0x110   : > { %v716_v44 = vadd.f32 %v715_v37, %v714_v34  ;;  %v1400_v56 = vrot.slane %v1389_v53, 3  ;;  %v1154_v37 = vperm.slane %v1152_v22, 0  ;;  %v863_v22 = vadd.f32 %v2887_v4, %v2991_v38 }
 0x112   : > { %v717_v51 = vrot.slane %v716_v44, 1  ;;  %v1401_v28 = vsel %vm3647_vm6, %v1400_v56, %v1399_v14  ;;  %v1211_v14 = vpack.c.bf16 %v1195_v11, %v1195_v11  ;;  %v1184_v39 = vunpack.c.l.bf16 %v1154_v37 }
 0x113   : > { %2416 = vmatmul.msk.bf16.gmra.mxu3 %vm517_vm0, %v1254_v41  ;;  %v862_v56 = vadd.f32 %v2892_v5, %v2980_v9  ;;  %v1175_v9 = vunpack.c.l.bf16 %v877_v59 }
 0x114   : > { %v718_v54 = vadd.f32 %v717_v51, %v716_v44  ;;  %v1243_v23 = vunpack.c.l.b16 %v1211_v14  ;;  %v1198_v49 = vmul.f32 %v1184_v39, %v1174_v42  ;;  %v1197_v53 = vmul.f32 %v1184_v39, %v1173_v45  ;;  %v2456_v39 = vld [vmem:[%s3636_s5 + $0x8] sm:$0xff] }
 0x115   : > { %613 = vmatpush.bf16.msra.mxu1 %v2456_v39 }
 0x116   : > { %v741_v60 = vmul.f32 %v2785_v46, %v718_v54  ;;  %v2997_v62 = vpop.f32.mrf.mxu0  ;;  %v1255_v44 = vpack.c.b16 %v1244_v31, %v1243_v23  ;;  %v1214_v41 = vpack.c.bf16 %v1198_v49, %v1198_v49 }
 0x117   : > { %v720_v63 = vsel %vm517_vm0, %v2997_v62, 0.0  ;;  %v864_v14 = vadd.f32 %v2892_v5, %v2997_v62 }
 0x118   : > { %v753_v1 = vadd.f32 %v2870_v55, %v741_v60  ;;  %v721_v3 = vadd.f32 %v720_v63, %v719_v58  ;;  %v1213_v58 = vpack.c.bf16 %v1197_v53, %v1197_v53  ;;  %v878_v63 = vpack.c.bf16 %v862_v56, %v862_v56 }
 0x119   : > { %v880_v31 = vpack.c.bf16 %v864_v14, %v864_v14 }
 0x11a   : > { %v722_v13 = vrot.slane %v721_v3, 4  ;;  %v1366_v0 = vmul.f32 %v1350_v7, %v753_v1  ;;  %v1245_v1 = vunpack.c.l.b16 %v1213_v58  ;;  %v1176_v12 = vunpack.c.l.bf16 %v878_v63 }
 0x11b   : > { %v1178_v23 = vunpack.c.l.bf16 %v880_v31 }
 0x11c   : > { %v723_v17 = vadd.f32 %v722_v13, %v721_v3  ;;  %v1374_v10 = vpack.c.bf16 %v1366_v0, %v1366_v0  ;;  %v1158_v3 = vperm.slane %v1156_v50, 0 }
 0x11e   : > { %v724_v26 = vrot.slane %v723_v17, 2  ;;  %v1390_v29 = vunpack.c.l.b16 %v1374_v10  ;;  %v1185_v0 = vunpack.c.l.bf16 %v1158_v3 }
 0x120   : > { %v725_v33 = vadd.f32 %v724_v26, %v723_v17  ;;  %v1402_v34 = vrot.slane %v1390_v29, 2  ;;  %v1200_v52 = vmul.f32 %v1185_v0, %v1176_v12  ;;  %v1199_v16 = vmul.f32 %v1185_v0, %v1175_v9 }
 0x122   : > { %v726_v40 = vrot.slane %v725_v33, 1  ;;  %v1403_v61 = vsel %vm3646_vm7, %v1402_v34, %v1401_v28  ;;  %v1246_v28 = vunpack.c.l.b16 %v1214_v41  ;;  %v1216_v10 = vpack.c.bf16 %v1200_v52, %v1200_v52 }
 0x123   : > { %2417 = vmatmul.msk.bf16.gmra.mxu3 %vm517_vm0, %v1255_v44  ;;  %v1215_v21 = vpack.c.bf16 %v1199_v16, %v1199_v16 }
 0x124   : > { %v727_v43 = vadd.f32 %v726_v40, %v725_v33  ;;  %v1256_v13 = vpack.c.b16 %v1246_v28, %v1245_v1  ;;  %v1248_v29 = vunpack.c.l.b16 %v1216_v10  ;;  %v879_v33 = vpack.c.bf16 %v863_v22, %v863_v22 }
 0x125   : > { %v1247_v25 = vunpack.c.l.b16 %v1215_v21 }
 0x126   : > { %v742_v48 = vmul.f32 %v2785_v46, %v727_v43  ;;  %v1177_v36 = vunpack.c.l.bf16 %v879_v33 }
 0x128   : > { %v754_v51 = vadd.f32 %v2870_v55, %v742_v48  ;;  %v1114_v55 = vunpack.i.h.s16 %v1106_v35  ;;  %v1257_v35 = vpack.c.b16 %v1248_v29, %v1247_v25  ;;  %v2455_v48 = vld [vmem:[%s3636_s5] sm:$0xff] }
 0x129   : > { %614 = vmatpush.bf16.msra.mxu1 %v2455_v48 }
 0x12a   : > { %v1367_v54 = vmul.f32 %v1351_v24, %v754_v51  ;;  %v1122_v15 = vpack.i.b16 %v1114_v55, %v1114_v55 }
 0x12c   : > { %v1375_v57 = vpack.c.bf16 %v1367_v54, %v1367_v54  ;;  %v1130_v17 = vperm.slane %v1122_v15, 0  ;;  %2384 = vmatmul.msk.bf16.vlgmr.msra.gmra.mxu1 %vm517_vm0, %v2763_v6 }
 0x12e   : > { %v1391_v60 = vunpack.c.l.b16 %v1375_v57  ;;  %v1160_v26 = vpack.i.b16 %v1130_v17, %v1130_v17 }
 0x130   : > { %v1404_v32 = vrot.slane %v1391_v60, 1  ;;  %v1162_v34 = vperm.slane %v1160_v26, 0 }
 0x132   : > { %v1405_v7 = vsel %vm3645_vm8, %v1404_v32, %v1403_v61  ;;  %v1186_v37 = vunpack.c.l.bf16 %v1162_v34 }
 0x133   : > { %v1406_v11 = vpack.c.b16 %v1405_v7, %v1405_v7  ;;  %2418 = vmatmul.msk.bf16.gmra.mxu3 %vm517_vm0, %v1256_v13 }
 0x134   : > { %v1202_v40 = vmul.f32 %v1186_v37, %v1178_v23  ;;  %v1201_v61 = vmul.f32 %v1186_v37, %v1177_v36 }
 0x135   : > { %2421 = vmatmul.msk.bf16.vlgmr.msra.gmra.mxu2 %vm517_vm0, %v1406_v11 }
 0x136   : > { %v1218_v42 = vpack.c.bf16 %v1202_v40, %v1202_v40  ;;  %v1217_v5 = vpack.c.bf16 %v1201_v61, %v1201_v61 }
 0x138   : > { %v1250_v62 = vunpack.c.l.b16 %v1218_v42  ;;  %v1249_v43 = vunpack.c.l.b16 %v1217_v5 }
 0x13a   : > { %v1258_v44 = vpack.c.b16 %v1250_v62, %v1249_v43 }
 0x13c   : > { %2385 = vmatmul.msk.bf16.gmra.mxu1 %vm517_vm0, %v2793_v2 }
 0x143   : > { %2419 = vmatmul.msk.bf16.gmra.mxu3 %vm517_vm0, %v1257_v35 }
 0x14c   : > { %2386 = vmatmul.msk.bf16.gmra.mxu1 %vm517_vm0, %v2810_v8 }
 0x153   : > { %2420 = vmatmul.msk.bf16.gmra.mxu3 %vm517_vm0, %v1258_v44 }
 0x15c   : > { %2387 = vmatmul.msk.bf16.gmra.mxu1 %vm517_vm0, %v2821_v18 }
 0x166   : > { %v3027_v4 = vpop.f32.mrf.mxu3 }
 0x167   : > { %v1424_v60 = vsel %vm1423_vm10, %v3027_v4, -inf }
 0x16c   : > { %2388 = vmatmul.msk.bf16.gmra.mxu1 %vm517_vm0, %v2826_v19 }
 0x16e   : > { %v3029_v38 = vpop.f32.mrf.mxu3 }
 0x16f   : > { %v1425_v58 = vsel %vm1423_vm10, %v3029_v38, -inf }
 0x170   : > { %v1426_v63 = vmax.f32 %v1424_v60, %v1425_v58 }
 0x172   : > { %v1427_v3 = vrot.slane %v1426_v63, 4 }
 0x174   : > { %v1428_v13 = vmax.f32 %v1426_v63, %v1427_v3 }
 0x176   : > { %v3031_v45 = vpop.f32.mrf.mxu3  ;;  %v1429_v16 = vrot.slane %v1428_v13, 2 }
 0x177   : > { %v1433_v6 = vsel %vm1423_vm10, %v3031_v45, -inf }
 0x178   : > { %v1430_v21 = vmax.f32 %v1428_v13, %v1429_v16 }
 0x17a   : > { %v1431_v36 = vrot.slane %v1430_v21, 1 }
 0x17c   : > { %v1432_v44 = vmax.f32 %v1430_v21, %v1431_v36  ;;  %2389 = vmatmul.msk.bf16.gmra.mxu1 %vm517_vm0, %v2831_v20 }
 0x17e   : > { %v3036_v47 = vpop.f32.mrf.mxu3 }
 0x17f   : > { %v1434_v41 = vsel %vm1423_vm10, %v3036_v47, -inf }
 0x180   : > { %v1435_v30 = vmax.f32 %v1433_v6, %v1434_v41 }
 0x182   : > { %v1436_v32 = vrot.slane %v1435_v30, 4 }
 0x184   : > { %v1437_v7 = vmax.f32 %v1435_v30, %v1436_v32 }
 0x186   : > { %v1314_v49 = vpop.f32.mrf.mxu3  ;;  %v1438_v9 = vrot.slane %v1437_v7, 2 }
 0x187   : > { %v1442_v24 = vsel %vm1423_vm10, %v1314_v49, -inf }
 0x188   : > { %v1439_v17 = vmax.f32 %v1437_v7, %v1438_v9 }
 0x18a   : > { %v1440_v26 = vrot.slane %v1439_v17, 1 }
 0x18c   : > { %v1441_v40 = vmax.f32 %v1439_v17, %v1440_v26 }
 0x18e   : > { %v1316_v51 = vpop.f32.mrf.mxu3 }
 0x18f   : > { %v1443_v53 = vsel %vm1423_vm10, %v1316_v51, -inf }
 0x190   : > { %v1444_v27 = vmax.f32 %v1442_v24, %v1443_v53 }
 0x192   : > { %v1445_v50 = vrot.slane %v1444_v27, 4 }
 0x194   : > { %v1446_v55 = vmax.f32 %v1444_v27, %v1445_v50 }
 0x196   : > { %v3047_v54 = vpop.f32.mrf.mxu3  ;;  %v1447_v11 = vrot.slane %v1446_v55, 2 }
 0x197   : > { %v1451_v2 = vsel %vm1423_vm10, %v3047_v54, -inf }
 0x198   : > { %v1448_v0 = vmax.f32 %v1446_v55, %v1447_v11 }
 0x19a   : > { %v1449_v10 = vrot.slane %v1448_v0, 1 }
 0x19c   : > { %v1450_v25 = vmax.f32 %v1448_v0, %v1449_v10 }
 0x19e   : > { %v3051_v56 = vpop.f32.mrf.mxu3 }
 0x19f   : > { %v1452_v57 = vsel %vm1423_vm10, %v3051_v56, -inf }
 0x1a0   : > { %v1453_v28 = vmax.f32 %v1451_v2, %v1452_v57 }
 0x1a2   : > { %v1454_v59 = vrot.slane %v1453_v28, 4 }
 0x1a4   : > { %v1455_v12 = vmax.f32 %v1453_v28, %v1454_v59 }
 0x1a6   : > { %v3065_v1 = vpop.f32.mrf.mxu3  ;;  %v1456_v52 = vrot.slane %v1455_v12, 2 }
 0x1a7   : > { %v1460_v22 = vsel %vm1423_vm10, %v3065_v1, -inf }
 0x1a8   : > { %v1457_v14 = vmax.f32 %v1455_v12, %v1456_v52 }
 0x1aa   : > { %v1458_v23 = vrot.slane %v1457_v14, 1 }
 0x1ac   : > { %v1459_v62 = vmax.f32 %v1457_v14, %v1458_v23 }
 0x1ae   : > { %v3067_v15 = vpop.f32.mrf.mxu3 }
 0x1af   : > { %v1461_v8 = vsel %vm1423_vm10, %v3067_v15, -inf }
 0x1b0   : > { %v1462_v29 = vmax.f32 %v1460_v22, %v1461_v8 }
 0x1b2   : > { %v1463_v61 = vrot.slane %v1462_v29, 4 }
 0x1b4   : > { %v1464_v18 = vmax.f32 %v1462_v29, %v1463_v61 }
 0x1b6   : > { %v3077_v33 = vpop.f32.mrf.mxu3  ;;  %v1465_v28 = vrot.slane %v1464_v18, 2 }
 0x1b7   : > { %v1469_v27 = vsel %vm1423_vm10, %v3077_v33, -inf }
 0x1b8   : > { %v3073_v31 = vpop.f32.mrf.mxu2  ;;  %v1466_v13 = vmax.f32 %v1464_v18, %v1465_v28 }
 0x1b9   : > { %v1498_v34 = vrot.slane %v3073_v31, 2  ;;  %v1497_v35 = vrot.slane %v3073_v31, 1  ;;  %v1499_v42 = vrot.slane %v3073_v31, 3  ;;  %v1512_v6 = vmax.f32 %v1432_v44, %v3073_v31 }
 0x1ba   : > { %v1467_v17 = vrot.slane %v1466_v13, 1  ;;  %v1500_v22 = vrot.slane %v3073_v31, 4 }
 0x1bb   : > { %v1514_v37 = vmax.f32 %v1450_v25, %v1498_v34  ;;  %v1513_v43 = vmax.f32 %v1441_v40, %v1497_v35  ;;  %v1515_v53 = vmax.f32 %v1459_v62, %v1499_v42  ;;  %v1520_v29 = vperm.slane %v1512_v6, 0 }
 0x1bc   : > { %v1468_v23 = vmax.f32 %v1466_v13, %v1467_v17  ;;  %v1501_v42 = vrot.slane %v3073_v31, 5 }
 0x1bd   : > { %v1522_v5 = vperm.slane %v1514_v37, 0  ;;  %v1523_v50 = vperm.slane %v1515_v53, 0  ;;  %v1584_v2 = vrot.slane %v1513_v43, 7  ;;  %v1588_v12 = vrot.slane %v1515_v53, 5 }
 0x1be   : > { %v3084_v41 = vpop.f32.mrf.mxu3  ;;  %v1521_v10 = vperm.slane %v1513_v43, 0  ;;  %v3127_v44 = vmax.f32 %v1468_v23, %v1500_v22  ;;  %v1529_v18 = vsub.f32 %v3029_v38, %v1520_v29 }
 0x1bf   : > { %v1532_v39 = vsub.f32 %v1314_v49, %v1522_v5  ;;  %v1533_v48 = vsub.f32 %v1316_v51, %v1522_v5  ;;  %v1470_v58 = vsel %vm1423_vm10, %v3084_v41, -inf  ;;  %v1586_v49 = vrot.slane %v1514_v37, 6 }
 0x1c0   : > { %v1421_v24 = vpop.f32.mrf.mxu2  ;;  %v1471_v60 = vmax.f32 %v1469_v27, %v1470_v58  ;;  %v1534_v51 = vsub.f32 %v3047_v54, %v1523_v50  ;;  %v1535_v63 = vsub.f32 %v3051_v56, %v1523_v50  ;;  %v1585_v32 = vsel %vm1043_vm2, %v1584_v2, %v1512_v6 }
 0x1c1   : > { %v1552_v57 = vmul.f32 1.442695, %v1532_v39  ;;  %v1554_v30 = vmul.f32 1.442695, %v1533_v48  ;;  %v1587_v7 = vsel %vm1045_vm3, %v1586_v49, %v1585_v32  ;;  %v1530_v36 = vsub.f32 %v3031_v45, %v1521_v10 }
 0x1c2   : > { %v1472_v55 = vrot.slane %v1471_v60, 4  ;;  %v1556_v59 = vmul.f32 1.442695, %v1534_v51  ;;  %v1558_v3 = vmul.f32 1.442695, %v1535_v63  ;;  %v3098_v56 = vsel %vm1047_vm4, %v1588_v12, %v1587_v7 }
 0x1c3   : > { %2509 = vpow2.f32 %v1552_v57  ;;  %v1531_v40 = vsub.f32 %v3036_v47, %v1521_v10  ;;  %v1528_v39 = vsub.f32 %v3027_v4, %v1520_v29  ;;  %v1548_v48 = vmul.f32 1.442695, %v1530_v36 }
 0x1c4   : > { %2511 = vpow2.f32 %v1554_v30  ;;  %v1473_v11 = vmax.f32 %v1471_v60, %v1472_v55  ;;  %v1524_v27 = vperm.slane %v3127_v44, 0  ;;  %v1546_v58 = vmul.f32 1.442695, %v1529_v18 }
 0x1c5   : > { %2513 = vpow2.f32 %v1556_v59  ;;  %v1550_v47 = vmul.f32 1.442695, %v1531_v40  ;;  %v1544_v6 = vmul.f32 1.442695, %v1528_v39  ;;  %v1502_v59 = vrot.slane %v3073_v31, 6  ;;  %v2559_v40 = vld [vmem:[%s2760_s17 + $0x30] sm:$0xff] }
 0x1c6   : > { %v1474_v9 = vrot.slane %v1473_v11, 2  ;;  %v3095_v54 = vpop.f32.mrf.mxu3  ;;  %2515 = vpow2.f32 %v1558_v3  ;;  %v1536_v38 = vsub.f32 %v3065_v1, %v1524_v27  ;;  %v1537_v60 = vsub.f32 %v3067_v15, %v1524_v27  ;;  %2390 = vmatmul.msk.bf16.gmra.mxu1 %vm517_vm0, %v2559_v40 }
 0x1c7   : > { %v1478_v62 = vsel %vm1423_vm10, %v3095_v54, -inf  ;;  %2517 = vpow2.f32 %v1548_v48 }
 0x1c8   : > { %v1475_v52 = vmax.f32 %v1473_v11, %v1474_v9  ;;  %2519 = vpow2.f32 %v1550_v47  ;;  %v1560_v32 = vmul.f32 1.442695, %v1536_v38  ;;  %v1562_v3 = vmul.f32 1.442695, %v1537_v60 }
 0x1c9   : > { %v3100_v0 = vpop.eup %2509  ;;  %2521 = vpow2.f32 %v1544_v6 }
 0x1ca   : > { %v3102_v16 = vpop.eup %2511  ;;  %v1620_v8 = vsel %vm1423_vm10, %v3100_v0, 0.0  ;;  %v1476_v14 = vrot.slane %v1475_v52, 1  ;;  %2523 = vpow2.f32 %v1546_v58 }
 0x1cb   : > { %v1621_v19 = vsel %vm1423_vm10, %v3102_v16, 0.0  ;;  %v3108_v21 = vpop.eup %2513  ;;  %2525 = vpow2.f32 %v1560_v32 }
 0x1cc   : > { %v3111_v26 = vadd.f32 %v1621_v19, %v1620_v8  ;;  %v3113_v25 = vpop.eup %2515  ;;  %v1629_v34 = vsel %vm1423_vm10, %v3108_v21, 0.0  ;;  %v1477_v35 = vmax.f32 %v1475_v52, %v1476_v14  ;;  %2527 = vpow2.f32 %v1562_v3 }
 0x1cd   : > { %v1630_v37 = vsel %vm1423_vm10, %v3113_v25, 0.0  ;;  %v3143_v63 = vpop.eup %2517 }
 0x1ce   : > { %v1336_v61 = vpop.f32.mrf.mxu3  ;;  %v3122_v5 = vadd.f32 %v1630_v37, %v1629_v34  ;;  %v3131_v24 = vmax.f32 %v1477_v35, %v1501_v42  ;;  %v3145_v20 = vpop.eup %2519  ;;  %v1611_v9 = vsel %vm1423_vm10, %v3143_v63, 0.0 }
 0x1cf   : > { %v1479_v43 = vsel %vm1423_vm10, %v1336_v61, -inf  ;;  %v3148_v1 = vpop.eup %2521  ;;  %v1612_v10 = vsel %vm1423_vm10, %v3145_v20, 0.0 }
 0x1d0   : > { %v1480_v45 = vmax.f32 %v1478_v62, %v1479_v43  ;;  %v1525_v30 = vperm.slane %v3131_v24, 0  ;;  %v3150_v11 = vpop.eup %2523  ;;  %v1602_v8 = vsel %vm1423_vm10, %v3148_v1, 0.0  ;;  %v1613_v34 = vadd.f32 %v1612_v10, %v1611_v9 }
 0x1d1   : > { %v1603_v14 = vsel %vm1423_vm10, %v3150_v11, 0.0  ;;  %v3170_v37 = vpop.eup %2525  ;;  %v1592_v60 = vrot.slane %v3131_v24, 3  ;;  %v1632_v24 = vrot.slane %v3122_v5, 4 }
 0x1d2   : > { %v1481_v53 = vrot.slane %v1480_v45, 4  ;;  %v1538_v49 = vsub.f32 %v3077_v33, %v1525_v30  ;;  %v1539_v51 = vsub.f32 %v3084_v41, %v1525_v30  ;;  %v1604_v42 = vadd.f32 %v1603_v14, %v1602_v8  ;;  %v3174_v62 = vpop.eup %2527 }
 0x1d3   : > { %v1638_v47 = vsel %vm1423_vm10, %v3170_v37, 0.0  ;;  %v1503_v30 = vrot.slane %v3073_v31, 7 }
 0x1d4   : > { %v1482_v57 = vmax.f32 %v1480_v45, %v1481_v53  ;;  %v1564_v7 = vmul.f32 1.442695, %v1538_v49  ;;  %v1566_v33 = vmul.f32 1.442695, %v1539_v51  ;;  %v1614_v45 = vrot.slane %v1613_v34, 4 }
 0x1d5   : > { %v1605_v48 = vrot.slane %v1604_v42, 4  ;;  %v1639_v53 = vsel %vm1423_vm10, %v3174_v62, 0.0 }
 0x1d6   : > { %v1483_v4 = vrot.slane %v1482_v57, 2  ;;  %v3137_v50 = vpop.f32.mrf.mxu3  ;;  %2529 = vpow2.f32 %v1564_v7  ;;  %v1615_v38 = vadd.f32 %v1614_v45, %v1613_v34  ;;  %v1640_v51 = vadd.f32 %v1639_v53, %v1638_v47  ;;  %v2560_v45 = vld [vmem:[%s2760_s17 + $0x38] sm:$0xff]  ;;  %s2258_s17 = sshll.u32 %s436_s15, 4  ;;  %s2259_s17 = int_to_ptr.vmem [resolvable:$true] %s2258_s17 }
 0x1d7   : > { %v1487_v41 = vsel %vm1423_vm10, %v3137_v50, -inf  ;;  %2531 = vpow2.f32 %v1566_v33  ;;  %2391 = vmatmul.msk.bf16.gmra.mxu1 %vm517_vm0, %v2560_v45 }
 0x1d8   : > { %v1484_v2 = vmax.f32 %v1482_v57, %v1483_v4  ;;  %v1641_v10 = vrot.slane %v1640_v51, 4  ;;  %v1616_v14 = vrot.slane %v1615_v38, 2 }
 0x1da   : > { %v1485_v28 = vrot.slane %v1484_v2, 1 }
 0x1dc   : > { %v1486_v55 = vmax.f32 %v1484_v2, %v1485_v28  ;;  %v3176_v39 = vpop.eup %2529  ;;  %v1590_v2 = vrot.slane %v3127_v44, 4 }
 0x1dd   : > { %v1647_v57 = vsel %vm1423_vm10, %v3176_v39, 0.0 }
 0x1de   : > { %v3152_v15 = vmax.f32 %v1486_v55, %v1502_v59  ;;  %v3154_v12 = vpop.f32.mrf.mxu3  ;;  %v1606_v55 = vadd.f32 %v1605_v48, %v1604_v42  ;;  %v1591_v59 = vsel %vm1049_vm5, %v1590_v2, %v3098_v56  ;;  %v1633_v42 = vadd.f32 %v1632_v24, %v3122_v5 }
 0x1df   : > { %v1488_v13 = vsel %vm1423_vm10, %v3154_v12, -inf }
 0x1e0   : > { %v1526_v52 = vperm.slane %v3152_v15, 0  ;;  %v1489_v17 = vmax.f32 %v1487_v41, %v1488_v13  ;;  %v1593_v13 = vsel %vm3647_vm6, %v1592_v60, %v1591_v59  ;;  %v1607_v8 = vrot.slane %v1606_v55, 2 }
 0x1e1   : > { %v1634_v53 = vrot.slane %v1633_v42, 2 }
 0x1e2   : > { %v1540_v19 = vsub.f32 %v3095_v54, %v1526_v52  ;;  %v1541_v22 = vsub.f32 %v1336_v61, %v1526_v52  ;;  %v1490_v29 = vrot.slane %v1489_v17, 4  ;;  %v1623_v54 = vrot.slane %v3111_v26, 4  ;;  %v3179_v61 = vpop.eup %2531 }
 0x1e3   : > { %v1648_v58 = vsel %vm1423_vm10, %v3179_v61, 0.0 }
 0x1e4   : > { %v1568_v23 = vmul.f32 1.442695, %v1540_v19  ;;  %v1570_v35 = vmul.f32 1.442695, %v1541_v22  ;;  %v1491_v36 = vmax.f32 %v1489_v17, %v1490_v29  ;;  %v1624_v6 = vadd.f32 %v1623_v54, %v3111_v26 }
 0x1e5   : > { %v1594_v26 = vrot.slane %v3152_v15, 2  ;;  %v1649_v3 = vadd.f32 %v1648_v58, %v1647_v57  ;;  %v1882_v15 = vld [vmem:[%s3658_s2] sm:$0x3]  ;;  %s2575_s2 = sshra.s32 %s2261_s0, 4  ;;  %s2576_s2 = int_to_ptr.hbm [resolvable:$true] %s2575_s2 }
 0x1e6   : > { %2533 = vpow2.f32 %v1568_v23  ;;  %v1492_v43 = vrot.slane %v1491_v36, 2  ;;  %v1625_v33 = vrot.slane %v1624_v6, 2  ;;  %v1949_v17 = vsel %vm1947_vm11, %v1882_v15, 0  ;;  %s2577_s3 = scalar_lea.hbm %s2576_s2, 8  ;;  %p2582_p0 = scmp.lt.s32.totalorder %s2576_s2, %s3644_s13 }
 0x1e7   : > { %2535 = vpow2.f32 %v1570_v35  ;;  %v1595_v56 = vsel %vm3646_vm7, %v1594_v26, %v1593_v13  ;;  %1958 = vmatpush.bf16.msrb.mxu2 %v1949_v17  ;;  %2011 = vmatpush.bf16.msrb.mxu0 %v1949_v17  ;;  %v1650_v19 = vrot.slane %v1649_v3, 4  ;;  %v3234_v17 = vpop.f32.mrf.mxu1  ;;  %p2578_p11 = scmp.ne.s32.totalorder %s2576_s2, %s2577_s3  ;;  %p2583_p1 = scmp.lt.s32.totalorder %s2581_s21, %s2577_s3 }
 0x1e8   : > { %v1493_v18 = vmax.f32 %v1491_v36, %v1492_v43  ;;  %v1642_v43 = vadd.f32 %v1641_v10, %v1640_v51  ;;  %v1626_v47 = vadd.f32 %v1625_v33, %v1624_v6 }
 0x1e9   : > { %v1651_v48 = vadd.f32 %v1650_v19, %v1649_v3  ;;  %p2579_p12 = pnand %p2578_p11, %p2731_p5  ;;  %p2584_p2 = por %p2583_p1, %p2582_p0 }
 0x1ea   : > { %v1494_v27 = vrot.slane %v1493_v18, 1 }
 0x1eb   : > { %v1652_v57 = vrot.slane %v1651_v48, 2  ;;  %p2580_p13 = pneg %p2579_p12 }
 0x1ec   : > { %v3191_v4 = vpop.eup %2533  ;;  %v1495_v49 = vmax.f32 %v1493_v18, %v1494_v27  ;;  %v1617_v18 = vadd.f32 %v1616_v14, %v1615_v38  ;;  %v1643_v27 = vrot.slane %v1642_v43, 2 }
 0x1ed   : > { %v3195_v28 = vpop.eup %2535  ;;  %v1656_v32 = vsel %vm1423_vm10, %v3191_v4, 0.0  ;;  %p2585_p3 = pnand %p2584_p2, %p2580_p13 }
 0x1ee   : > { %v1657_v7 = vsel %vm1423_vm10, %v3195_v28, 0.0  ;;  %v1519_v44 = vmax.f32 %v1495_v49, %v1503_v30  ;;  %v1627_v30 = vrot.slane %v1626_v47, 1  ;;  %v1635_v49 = vadd.f32 %v1634_v53, %v1633_v42 }
 0x1ef   : > { %v1658_v41 = vadd.f32 %v1657_v7, %v1656_v32  ;;  %v1644_v38 = vadd.f32 %v1643_v27, %v1642_v43  ;;  %v1653_v32 = vadd.f32 %v1652_v57, %v1651_v48  ;;  %v755_v53 = vsel %vm517_vm0, %v3234_v17, 0.0 }
 0x1f0   : > { %v1527_v9 = vperm.slane %v1519_v44, 0  ;;  %v1596_v52 = vrot.slane %v1519_v44, 1  ;;  %v1628_v3 = vadd.f32 %v1627_v30, %v1626_v47  ;;  %v3255_v30 = vpop.f32.mrf.mxu1 }
 0x1f1   : > { %v1659_v23 = vrot.slane %v1658_v41, 4  ;;  %v1654_v10 = vrot.slane %v1653_v32, 1 }
 0x1f2   : > { %v1542_v22 = vsub.f32 %v3137_v50, %v1527_v9  ;;  %v1543_v29 = vsub.f32 %v3154_v12, %v1527_v9  ;;  %v1597_v34 = vsel %vm3645_vm8, %v1596_v52, %v1595_v56  ;;  %v1608_v50 = vadd.f32 %v1607_v8, %v1606_v55 }
 0x1f3   : > { %v1599_v35 = vsub.f32 %v3073_v31, %v1597_v34  ;;  %v1660_v12 = vadd.f32 %v1659_v23, %v1658_v41  ;;  %v1618_v31 = vrot.slane %v1617_v18, 1  ;;  %v1636_v52 = vrot.slane %v1635_v49, 1 }
 0x1f4   : > { %v1572_v36 = vmul.f32 1.442695, %v1542_v22  ;;  %v1574_v40 = vmul.f32 1.442695, %v1543_v29  ;;  %v1609_v58 = vrot.slane %v1608_v50, 1  ;;  %v1645_v56 = vrot.slane %v1644_v38, 1 }
 0x1f5   : > { %v1600_v54 = vmul.f32 1.442695, %v1599_v35  ;;  %v1661_v5 = vrot.slane %v1660_v12, 2  ;;  %v1619_v6 = vadd.f32 %v1618_v31, %v1617_v18  ;;  %v1637_v29 = vadd.f32 %v1636_v52, %v1635_v49 }
 0x1f6   : > { %2537 = vpow2.f32 %v1572_v36  ;;  %v1610_v59 = vadd.f32 %v1609_v58, %v1608_v50  ;;  %v1646_v35 = vadd.f32 %v1645_v56, %v1644_v38  ;;  %v1655_v42 = vadd.f32 %v1654_v10, %v1653_v32 }
 0x1f7   : > { %2539 = vpow2.f32 %v1574_v40  ;;  %v1662_v7 = vadd.f32 %v1661_v5, %v1660_v12 }
 0x1f8   : > { %2541 = vpow2.f32 %v1600_v54 }
 0x1f9   : > { %v1663_v8 = vrot.slane %v1662_v7, 1 }
 0x1fb   : > { %v3239_v36 = vadd.f32 %v1663_v8, %v1662_v7 }
 0x1fc   : > { %v3217_v2 = vpop.eup %2537 }
 0x1fd   : > { %v3219_v60 = vpop.eup %2539  ;;  %v1665_v26 = vsel %vm1423_vm10, %v3217_v2, 0.0 }
 0x1fe   : > { %v3223_v51 = vpop.eup %2541  ;;  %v1666_v55 = vsel %vm1423_vm10, %v3219_v60, 0.0 }
 0x1ff   : > { %v1667_v44 = vadd.f32 %v1666_v55, %v1665_v26  ;;  %v1675_v33 = vrot.slane %v3223_v51, 1  ;;  %v1676_v24 = vrot.slane %v3223_v51, 2  ;;  %v1690_v41 = vadd.f32 %v3223_v51, %v1610_v59 }
 0x200   : > { %v1677_v19 = vrot.slane %v3223_v51, 3  ;;  %v1681_v45 = vrot.slane %v3223_v51, 7  ;;  %v1678_v18 = vrot.slane %v3223_v51, 4  ;;  %v1679_v48 = vrot.slane %v3223_v51, 5 }
 0x201   : > { %v1668_v15 = vrot.slane %v1667_v44, 4  ;;  %v3230_v13 = vadd.f32 %v1675_v33, %v1619_v6  ;;  %v3232_v9 = vadd.f32 %v1676_v24, %v1628_v3  ;;  %2543 = vrcp.f32 %v1690_v41 }
 0x202   : > { %v1707_v34 = vand.u32 2147483647, %v1690_v41  ;;  %v1709_v23 = vand.u32 2147483648, %v1690_v41  ;;  %v3241_v43 = vadd.f32 %v1677_v19, %v1637_v29  ;;  %v1680_v50 = vrot.slane %v3223_v51, 6 }
 0x203   : > { %v1669_v14 = vadd.f32 %v1668_v15, %v1667_v44  ;;  %2545 = vrcp.f32 %v3230_v13  ;;  %vm1703_vm12 = vweird.f32 %v1690_v41  ;;  %vm1718_vm14 = vweird.f32 %v3230_v13 }
 0x204   : > { %2547 = vrcp.f32 %v3232_v9  ;;  %vm3250_vm13 = vcmp.eq.f32.partialorder %v1707_v34, 8.507059e+37  ;;  %v1710_v57 = vor.u32 1.1754944e-38, %v1709_v23  ;;  %v1722_v38 = vand.u32 2147483647, %v3230_v13 }
 0x205   : > { %v1670_v22 = vrot.slane %v1669_v14, 2  ;;  %2549 = vrcp.f32 %v3241_v43  ;;  %v756_v26 = vsel %vm517_vm0, %v3255_v30, 0.0  ;;  %v1724_v32 = vand.u32 2147483648, %v3230_v13 }
 0x206   : > { %v3263_v59 = vadd.f32 %v756_v26, %v755_v53  ;;  %v3265_v44 = vadd.f32 %v1678_v18, %v1646_v35  ;;  %v1737_v15 = vand.u32 2147483647, %v3232_v9  ;;  %vm3270_vm9 = vcmp.eq.f32.partialorder %v1722_v38, 8.507059e+37  ;;  %v3287_v18 = vpop.f32.mrf.mxu1 }
 0x207   : > { %v1671_v40 = vadd.f32 %v1670_v22, %v1669_v14  ;;  %v2544_v54 = vpop.eup %2543  ;;  %vm1733_vm11 = vweird.f32 %v3232_v9  ;;  %v1739_v8 = vand.u32 2147483648, %v3232_v9  ;;  %v1725_v23 = vor.u32 1.1754944e-38, %v1724_v32 }
 0x208   : > { %v1699_v27 = vmul.f32 %v2544_v54, %v1690_v41  ;;  %vm1704_vm15 = vweird.f32 %v2544_v54  ;;  %2551 = vrcp.f32 %v3265_v44  ;;  %v1754_v38 = vand.u32 2147483648, %v3241_v43 }
 0x209   : > { %v2546_v47 = vpop.eup %2545  ;;  %v1672_v12 = vrot.slane %v1671_v40, 1  ;;  %vm1705_vm8 = vmor %vm1703_vm12, %vm1704_vm15  ;;  %vm1738_vm12 = vcmp.eq.f32.partialorder %v1737_v15, 8.507059e+37 }
 0x20a   : > { %v1714_v58 = vmul.f32 %v2546_v47, %v3230_v13  ;;  %v2548_v5 = vpop.eup %2547  ;;  %v1700_v49 = vsub.f32 1.0, %v1699_v27  ;;  %vm1719_vm1 = vweird.f32 %v2546_v47  ;;  %v1740_v13 = vor.u32 1.1754944e-38, %v1739_v8 }
 0x20b   : > { %v1729_v55 = vmul.f32 %v2548_v5, %v3232_v9  ;;  %v1673_v3 = vadd.f32 %v1672_v12, %v1671_v40  ;;  %v3268_v52 = vpop.eup %2549  ;;  %vm1734_vm7 = vweird.f32 %v2548_v5  ;;  %vm1720_vm6 = vmor %vm1718_vm14, %vm1719_vm1  ;;  %v3295_v12 = vadd.f32 %v1679_v48, %v1655_v42 }
 0x20c   : > { %v1715_v6 = vsub.f32 1.0, %v1714_v58  ;;  %v1701_v7 = vmul.f32 %v2544_v54, %v1700_v49  ;;  %v1744_v22 = vmul.f32 %v3268_v52, %v3241_v43  ;;  %v1755_v10 = vor.u32 1.1754944e-38, %v1754_v38 }
 0x20d   : > { %v1730_v24 = vsub.f32 1.0, %v1729_v55  ;;  %v3279_v29 = vadd.f32 %v1681_v45, %v1673_v3  ;;  %v1769_v8 = vand.u32 2147483648, %v3265_v44  ;;  %vm1763_vm1 = vweird.f32 %v3265_v44 }
 0x20e   : > { %v1716_v33 = vmul.f32 %v2546_v47, %v1715_v6  ;;  %v1702_v56 = vadd.f32 %v2544_v54, %v1701_v7  ;;  %v1745_v31 = vsub.f32 1.0, %v1744_v22  ;;  %v3325_v15 = vpop.f32.mrf.mxu1  ;;  %v764_v22 = vsel %vm517_vm0, %v3287_v18, 0.0 }
 0x20f   : > { %v1731_v19 = vmul.f32 %v2548_v5, %v1730_v24  ;;  %2553 = vrcp.f32 %v3279_v29  ;;  %v1767_v24 = vand.u32 2147483647, %v3265_v44  ;;  %v765_v3 = vsel %vm517_vm0, %v3325_v15, 0.0 }
 0x210   : > { %v1717_v14 = vadd.f32 %v2546_v47, %v1716_v33  ;;  %v1706_v34 = vsel %vm1705_vm8, %v2544_v54, %v1702_v56  ;;  %vm1735_vm8 = vmor %vm1733_vm11, %vm1734_vm7  ;;  %v1746_v48 = vmul.f32 %v3268_v52, %v1745_v31  ;;  %vm1748_vm7 = vweird.f32 %v3241_v43 }
 0x211   : > { %v1711_v41 = vsel %vm3250_vm13, %v1710_v57, %v1706_v34  ;;  %v1732_v40 = vadd.f32 %v2548_v5, %v1731_v19  ;;  %2555 = vrcp.f32 %v3295_v12  ;;  %v1782_v19 = vand.u32 2147483647, %v3295_v12 }
 0x212   : > { %v1721_v35 = vsel %vm1720_vm6, %v2546_v47, %v1717_v14  ;;  %v1818_v54 = vperm.slane %v1711_v41, 0  ;;  %v3299_v47 = vadd.f32 %v1680_v50, %v3239_v36  ;;  %vm1749_vm6 = vweird.f32 %v3268_v52 }
 0x213   : > { %v3291_v45 = vsel %vm3270_vm9, %v1725_v23, %v1721_v35  ;;  %v1736_v53 = vsel %vm1735_vm8, %v2548_v5, %v1732_v40  ;;  %v2552_v5 = vpop.eup %2551  ;;  %vm3316_vm13 = vmor %vm1748_vm7, %vm1749_vm6  ;;  %vm1768_vm9 = vcmp.eq.f32.partialorder %v1767_v24, 8.507059e+37  ;;  %v1784_v35 = vand.u32 2147483648, %v3295_v12 }
 0x214   : > { %v1866_v27 = vrot.slane %v3291_v45, 7  ;;  %v3302_v57 = vsel %vm1738_vm12, %v1740_v13, %v1736_v53  ;;  %v1826_v58 = vmul.f32 %v3148_v1, %v1818_v54  ;;  %v1827_v9 = vmul.f32 %v3150_v11, %v1818_v54 }
 0x215   : > { %v1868_v42 = vrot.slane %v3302_v57, 6  ;;  %v1747_v1 = vadd.f32 %v3268_v52, %v1746_v48  ;;  %v1752_v11 = vand.u32 2147483647, %v3241_v43  ;;  %v1759_v6 = vmul.f32 %v2552_v5, %v3265_v44  ;;  %v3327_v43 = vpop.eup %2553 }
 0x216   : > { %v1867_v49 = vsel %vm1043_vm2, %v1866_v27, %v1711_v41  ;;  %v1842_v36 = vpack.c.bf16 %v1826_v58, %v1826_v58  ;;  %v1843_v50 = vpack.c.bf16 %v1827_v9, %v1827_v9  ;;  %vm1764_vm15 = vweird.f32 %v2552_v5  ;;  %v3359_v38 = vpop.f32.mrf.mxu1 }
 0x217   : > { %v1869_v26 = vsel %vm1045_vm3, %v1868_v42, %v1867_v49  ;;  %v1751_v7 = vsel %vm3316_vm13, %v3268_v52, %v1747_v1  ;;  %v1760_v33 = vsub.f32 1.0, %v1759_v6  ;;  %vm1753_vm14 = vcmp.eq.f32.partialorder %v1752_v11, 8.507059e+37  ;;  %vm1765_vm11 = vmor %vm1763_vm1, %vm1764_vm15  ;;  %v2556_v13 = vpop.eup %2555 }
 0x218   : > { %v1899_v32 = vunpack.c.l.b16 %v1842_v36  ;;  %v1900_v55 = vunpack.c.l.b16 %v1843_v50  ;;  %2557 = vrcp.f32 %v3299_v47  ;;  %v3332_v52 = vsel %vm1753_vm14, %v1755_v10, %v1751_v7 }
 0x219   : > { %v1761_v14 = vmul.f32 %v2552_v5, %v1760_v33  ;;  %v1804_v23 = vmul.f32 %v3327_v43, %v3279_v29  ;;  %v1770_v41 = vor.u32 1.1754944e-38, %v1769_v8  ;;  %vm1778_vm12 = vweird.f32 %v3295_v12 }
 0x21a   : > { %v1915_v56 = vpack.c.b16 %v1900_v55, %v1899_v32  ;;  %v1797_v40 = vand.u32 2147483647, %v3299_v47  ;;  %v1799_v54 = vand.u32 2147483648, %v3299_v47  ;;  %v1870_v27 = vrot.slane %v3332_v52, 5 }
 0x21b   : > { %v1762_v34 = vadd.f32 %v2552_v5, %v1761_v14  ;;  %v1805_v53 = vsub.f32 1.0, %v1804_v23  ;;  %v1774_v58 = vmul.f32 %v2556_v13, %v3295_v12  ;;  %vm3348_vm8 = vcmp.eq.f32.partialorder %v1782_v19, 8.507059e+37 }
 0x21c   : > { %2422 = vmatmul.msk.bf16.vlgmr.msrb.gmra.mxu2 %vm1423_vm10, %v1915_v56  ;;  %vm1793_vm6 = vweird.f32 %v3299_v47  ;;  %vm1809_vm7 = vweird.f32 %v3327_v43  ;;  %v1812_v49 = vand.u32 2147483647, %v3279_v29  ;;  %v1871_v36 = vsel %vm1047_vm4, %v1870_v27, %v1869_v26 }
 0x21d   : > { %v1766_v44 = vsel %vm1765_vm11, %v2552_v5, %v1762_v34  ;;  %v1806_v48 = vmul.f32 %v3327_v43, %v1805_v53  ;;  %v1814_v5 = vand.u32 2147483648, %v3279_v29  ;;  %v1775_v1 = vsub.f32 1.0, %v1774_v58 }
 0x21e   : > { %v3345_v31 = vsel %vm1768_vm9, %v1770_v41, %v1766_v44  ;;  %v2558_v42 = vpop.eup %2557  ;;  %vm1808_vm13 = vweird.f32 %v3279_v29  ;;  %v1819_v6 = vperm.slane %v3291_v45, 0  ;;  %vm1779_vm14 = vweird.f32 %v2556_v13  ;;  %v3391_v53 = vpop.f32.mrf.mxu1 }
 0x21f   : > { %v1872_v50 = vrot.slane %v3345_v31, 4  ;;  %v1789_v11 = vmul.f32 %v2558_v42, %v3299_v47  ;;  %v1807_v32 = vadd.f32 %v3327_v43, %v1806_v48  ;;  %v1776_v26 = vmul.f32 %v2556_v13, %v1775_v1  ;;  %vm1810_vm15 = vmor %vm1808_vm13, %vm1809_vm7 }
 0x220   : > { %v1828_v33 = vmul.f32 %v3143_v63, %v1819_v6  ;;  %v1829_v24 = vmul.f32 %v3145_v20, %v1819_v6  ;;  %vm1813_vm1 = vcmp.eq.f32.partialorder %v1812_v49, 8.507059e+37  ;;  %v1815_v45 = vor.u32 1.1754944e-38, %v1814_v5  ;;  %vm1780_vm11 = vmor %vm1778_vm12, %vm1779_vm14 }
 0x221   : > { %v1873_v55 = vsel %vm1049_vm5, %v1872_v50, %v1871_v36  ;;  %v1790_v7 = vsub.f32 1.0, %v1789_v11  ;;  %v1811_v29 = vsel %vm1810_vm15, %v3327_v43, %v1807_v32  ;;  %v3373_v56 = vadd.f32 %v765_v3, %v764_v22 }
 0x222   : > { %v1777_v10 = vadd.f32 %v2556_v13, %v1776_v26  ;;  %vm1794_vm9 = vweird.f32 %v2558_v42  ;;  %v1844_v14 = vpack.c.bf16 %v1828_v33, %v1828_v33  ;;  %v1785_v19 = vor.u32 1.1754944e-38, %v1784_v35 }
 0x223   : > { %v1791_v8 = vmul.f32 %v2558_v42, %v1790_v7  ;;  %vm3378_vm7 = vcmp.eq.f32.partialorder %v1797_v40, 8.507059e+37  ;;  %v1816_v63 = vsel %vm1813_vm1, %v1815_v45, %v1811_v29  ;;  %v1845_v20 = vpack.c.bf16 %v1829_v24, %v1829_v24  ;;  %vm1795_vm13 = vmor %vm1793_vm6, %vm1794_vm9 }
 0x224   : > { %v1781_v43 = vsel %vm1780_vm11, %v2556_v13, %v1777_v10  ;;  %v1901_v41 = vunpack.c.l.b16 %v1844_v14  ;;  %v1820_v22 = vperm.slane %v3302_v57, 0  ;;  %v1800_v12 = vor.u32 1.1754944e-38, %v1799_v54 }
 0x225   : > { %v1792_v23 = vadd.f32 %v2558_v42, %v1791_v8  ;;  %v3385_v44 = vsel %vm3348_vm8, %v1785_v19, %v1781_v43  ;;  %v1902_v35 = vunpack.c.l.b16 %v1845_v20  ;;  %v773_v40 = vsel %vm517_vm0, %v3359_v38, 0.0 }
 0x226   : > { %v1874_v13 = vrot.slane %v3385_v44, 3  ;;  %v1830_v58 = vmul.f32 %v3100_v0, %v1820_v22  ;;  %v1831_v57 = vmul.f32 %v3102_v16, %v1820_v22  ;;  %v1878_v47 = vrot.slane %v1816_v63, 1  ;;  %v3413_v7 = vpop.f32.mrf.mxu1 }
 0x227   : > { %v1796_v27 = vsel %vm1795_vm13, %v2558_v42, %v1792_v23  ;;  %v1916_v49 = vpack.c.b16 %v1902_v35, %v1901_v41  ;;  %v774_v54 = vsel %vm517_vm0, %v3391_v53, 0.0  ;;  %vm3669_vm12 = vcmask 1045509  }
 0x228   : > { %v3398_v9 = vsel %vm3378_vm7, %v1800_v12, %v1796_v27  ;;  %v1875_v48 = vsel %vm3669_vm12, %v1874_v13, %v1873_v55  ;;  %v1846_v42 = vpack.c.bf16 %v1830_v58, %v1830_v58  ;;  %v1847_v36 = vpack.c.bf16 %v1831_v57, %v1831_v57 }
 0x229   : > { %v1876_v5 = vrot.slane %v3398_v9, 2  ;;  %v3405_v0 = vadd.f32 %v774_v54, %v773_v40  ;;  %v1821_v16 = vperm.slane %v3332_v52, 0  ;;  %vm3670_vm8 = vcmask 1046534  }
 0x22a   : > { %v1903_v1 = vunpack.c.l.b16 %v1846_v42  ;;  %v1904_v11 = vunpack.c.l.b16 %v1847_v36  ;;  %vm3671_vm6 = vcmask 1047559   ;;  %v1825_v8 = vperm.slane %v1816_v63, 0  ;;  %vm3673_vm14 = vmmov %vm3670_vm8 }
 0x22b   : > { %v1877_v50 = vsel %vm3670_vm8, %v1876_v5, %v1875_v48  ;;  %v1832_v55 = vmul.f32 %v3108_v21, %v1821_v16  ;;  %v1833_v26 = vmul.f32 %v3113_v25, %v1821_v16  ;;  %v1822_v41 = vperm.slane %v3345_v31, 0  ;;  %vm3674_vm15 = vmmov %vm3671_vm6 }
 0x22c   : > { %2423 = vmatmul.msk.bf16.gmra.mxu2 %vm1423_vm10, %v1916_v49  ;;  %v1879_v6 = vsel %vm3671_vm6, %v1878_v47, %v1877_v50  ;;  %v1917_v3 = vpack.c.b16 %v1904_v11, %v1903_v1  ;;  %v1841_v19 = vmul.f32 %v3219_v60, %v1825_v8  ;;  %v1823_v57 = vperm.slane %v3385_v44, 0 }
 0x22d   : > { %v1881_v32 = vmul.f32 %v3223_v51, %v1879_v6  ;;  %v1848_v24 = vpack.c.bf16 %v1832_v55, %v1832_v55  ;;  %v1849_v29 = vpack.c.bf16 %v1833_v26, %v1833_v26  ;;  %v1840_v51 = vmul.f32 %v3217_v2, %v1825_v8 }
 0x22e   : > { %v3416_v14 = vpop.f32.mrf.mxu1  ;;  %v1857_v34 = vpack.c.bf16 %v1841_v19, %v1841_v19  ;;  %v1834_v2 = vmul.f32 %v3170_v37, %v1822_v41  ;;  %v1835_v60 = vmul.f32 %v3174_v62, %v1822_v41  ;;  %v1836_v31 = vmul.f32 %v3176_v39, %v1823_v57 }
 0x22f   : > { %v2000_v33 = vpack.c.bf16 %v1881_v32, %v1881_v32  ;;  %v1905_v52 = vunpack.c.l.b16 %v1848_v24  ;;  %v1906_v45 = vunpack.c.l.b16 %v1849_v29  ;;  %v1856_v21 = vpack.c.bf16 %v1840_v51, %v1840_v51 }
 0x230   : > { %v3423_v20 = vunpack.c.l.b16 %v1857_v34  ;;  %v1850_v12 = vpack.c.bf16 %v1834_v2, %v1834_v2  ;;  %v1851_v35 = vpack.c.bf16 %v1835_v60, %v1835_v60  ;;  %v1837_v47 = vmul.f32 %v3179_v61, %v1823_v57 }
 0x231   : > { %2430 = vmatmul.msk.bf16.vlgmr.msrb.gmra.mxu0 %vm1423_vm10, %v2000_v33  ;;  %v1918_v10 = vpack.c.b16 %v1906_v45, %v1905_v52  ;;  %v3421_v25 = vunpack.c.l.b16 %v1856_v21  ;;  %v1852_v37 = vpack.c.bf16 %v1836_v31, %v1836_v31  ;;  %v782_v5 = vsel %vm517_vm0, %v3413_v7, 0.0 }
 0x232   : > { %v1907_v40 = vunpack.c.l.b16 %v1850_v12  ;;  %v1908_v27 = vunpack.c.l.b16 %v1851_v35  ;;  %v1853_v49 = vpack.c.bf16 %v1837_v47, %v1837_v47  ;;  %v783_v42 = vsel %vm517_vm0, %v3416_v14, 0.0 }
 0x233   : > { %v1922_v43 = vpack.c.b16 %v3423_v20, %v3421_v25  ;;  %v1909_v54 = vunpack.c.l.b16 %v1852_v37  ;;  %v784_v36 = vadd.f32 %v783_v42, %v782_v5  ;;  %v1824_v16 = vperm.slane %v3398_v9, 0 }
 0x234   : > { %v1919_v58 = vpack.c.b16 %v1908_v27, %v1907_v40  ;;  %v1910_v48 = vunpack.c.l.b16 %v1853_v49  ;;  %v767_v39 = vrot.slane %v3373_v56, 4  ;;  %v776_v50 = vrot.slane %v3405_v0, 4 }
 0x235   : > { %v785_v1 = vrot.slane %v784_v36, 4  ;;  %v1838_v11 = vmul.f32 %v3191_v4, %v1824_v16  ;;  %v1839_v6 = vmul.f32 %v3195_v28, %v1824_v16  ;;  %v758_v32 = vrot.slane %v3263_v59, 4  ;;  %v3485_v16 = vld [vmem:[%s3641_s10] ss:$0 sm:$0xff] }
 0x236   : > { %v3427_v23 = vpop.f32.mrf.mxu1  ;;  %v1920_v44 = vpack.c.b16 %v1910_v48, %v1909_v54  ;;  %v777_v55 = vadd.f32 %v776_v50, %v3405_v0 }
 0x237   : > { %v786_v9 = vadd.f32 %v785_v1, %v784_v36  ;;  %v1854_v26 = vpack.c.bf16 %v1838_v11, %v1838_v11  ;;  %v1855_v33 = vpack.c.bf16 %v1839_v6, %v1839_v6  ;;  %v759_v24 = vadd.f32 %v758_v32, %v3263_v59 }
 0x238   : > { %v778_v52 = vrot.slane %v777_v55, 2 }
 0x239   : > { %v787_v45 = vrot.slane %v786_v9, 2  ;;  %v1912_v8 = vunpack.c.l.b16 %v1855_v33  ;;  %v760_v4 = vrot.slane %v759_v24, 2 }
 0x23a   : > { %v779_v19 = vadd.f32 %v778_v52, %v777_v55 }
 0x23b   : > { %v788_v21 = vadd.f32 %v787_v45, %v786_v9  ;;  %v761_v41 = vadd.f32 %v760_v4, %v759_v24 }
 0x23c   : > { %2424 = vmatmul.msk.bf16.gmra.mxu2 %vm1423_vm10, %v1917_v3  ;;  %v768_v3 = vadd.f32 %v767_v39, %v3373_v56  ;;  %v791_v56 = vsel %vm517_vm0, %v3427_v23, 0.0  ;;  %v780_v2 = vrot.slane %v779_v19, 1 }
 0x23d   : > { %v789_v40 = vrot.slane %v788_v21, 1  ;;  %v762_v27 = vrot.slane %v761_v41, 1 }
 0x23e   : > { %v3429_v63 = vpop.f32.mrf.mxu1  ;;  %v769_v29 = vrot.slane %v768_v3, 2  ;;  %v781_v49 = vadd.f32 %v780_v2, %v779_v19 }
 0x23f   : > { %v792_v0 = vsel %vm517_vm0, %v3429_v63, 0.0  ;;  %v790_v48 = vadd.f32 %v789_v40, %v788_v21 }
 0x240   : > { %v770_v28 = vadd.f32 %v769_v29, %v768_v3  ;;  %v793_v60 = vadd.f32 %v792_v0, %v791_v56  ;;  %v829_v1 = vmul.f32 %v781_v49, %v2785_v46  ;;  %v3513_v49 = vld [vmem:[%s3642_s11 + $0x8] sm:$0xff] }
 0x241   : > { %v830_v6 = vmul.f32 %v790_v48, %v2785_v46 }
 0x242   : > { %v771_v59 = vrot.slane %v770_v28, 1  ;;  %v794_v54 = vrot.slane %v793_v60, 4  ;;  %v841_v33 = vadd.f32 %v3485_v16, %v829_v1 }
 0x243   : > { %v842_v29 = vadd.f32 %v3485_v16, %v830_v6 }
 0x244   : > { %v795_v11 = vadd.f32 %v794_v54, %v793_v60  ;;  %v3504_v60 = vld [vmem:[%s3642_s11] sm:$0xff] }
 0x245   : > { %v2133_v21 = vrot.slane %v842_v29, 5 }
 0x246   : > { %v3435_v22 = vpop.f32.mrf.mxu1  ;;  %v796_v24 = vrot.slane %v795_v11, 2 }
 0x247   : > { %v800_v12 = vsel %vm517_vm0, %v3435_v22, 0.0 }
 0x248   : > { %v797_v19 = vadd.f32 %v796_v24, %v795_v11  ;;  %v885_v24 = vadd.f32 %v3504_v60, %v3287_v18  ;;  %v886_v18 = vadd.f32 %v3513_v49, %v3325_v15 }
 0x24c   : > { %2425 = vmatmul.msk.bf16.gmra.mxu2 %vm1423_vm10, %v1918_v10  ;;  %v1911_v10 = vunpack.c.l.b16 %v1854_v26 }
 0x24e   : > { %v3437_v13 = vpop.f32.mrf.mxu1  ;;  %v1921_v34 = vpack.c.b16 %v1912_v8, %v1911_v10 }
 0x24f   : > { %v801_v35 = vsel %vm517_vm0, %v3437_v13, 0.0 }
 0x250   : > { %v802_v57 = vadd.f32 %v801_v35, %v800_v12  ;;  %v883_v35 = vadd.f32 %v3504_v60, %v3234_v17  ;;  %v2462_v17 = vld [vmem:[%s3637_s6 + $0x8] sm:$0xff] }
 0x251   : > { %2237 = vmatpush.bf16.msrb.mxu1 %v2462_v17 }
 0x252   : > { %v803_v50 = vrot.slane %v802_v57, 4 }
 0x254   : > { %v804_v26 = vadd.f32 %v803_v50, %v802_v57 }
 0x256   : > { %v3443_v62 = vpop.f32.mrf.mxu1  ;;  %v805_v4 = vrot.slane %v804_v26, 2 }
 0x257   : > { %v809_v31 = vsel %vm517_vm0, %v3443_v62, 0.0 }
 0x25c   : > { %2426 = vmatmul.msk.bf16.gmra.mxu2 %vm1423_vm10, %v1919_v58  ;;  %v772_v58 = vadd.f32 %v771_v59, %v770_v28  ;;  %v2131_v28 = vrot.slane %v841_v33, 6  ;;  %v798_v59 = vrot.slane %v797_v19, 1 }
 0x25e   : > { %v3452_v61 = vpop.f32.mrf.mxu1  ;;  %v828_v39 = vmul.f32 %v772_v58, %v2785_v46  ;;  %v799_v40 = vadd.f32 %v798_v59, %v797_v19 }
 0x25f   : > { %v810_v47 = vsel %vm517_vm0, %v3452_v61, 0.0 }
 0x260   : > { %v811_v5 = vadd.f32 %v810_v47, %v809_v31  ;;  %v840_v9 = vadd.f32 %v3485_v16, %v828_v39  ;;  %v899_v31 = vpack.c.bf16 %v883_v35, %v883_v35  ;;  %v831_v47 = vmul.f32 %v799_v40, %v2785_v46 }
 0x262   : > { %v812_v3 = vrot.slane %v811_v5, 4  ;;  %v2129_v8 = vrot.slane %v840_v9, 7 }
 0x264   : > { %v813_v45 = vadd.f32 %v812_v3, %v811_v5 }
 0x266   : > { %v3461_v51 = vpop.f32.mrf.mxu1  ;;  %v814_v0 = vrot.slane %v813_v45, 2 }
 0x267   : > { %v818_v42 = vsel %vm517_vm0, %v3461_v51, 0.0 }
 0x268   : > { %v815_v20 = vadd.f32 %v814_v0, %v813_v45 }
 0x26a   : > { %v816_v58 = vrot.slane %v815_v20, 1 }
 0x26c   : > { %2427 = vmatmul.msk.bf16.gmra.mxu2 %vm1423_vm10, %v1920_v44  ;;  %v763_v44 = vadd.f32 %v762_v27, %v761_v41  ;;  %v817_v48 = vadd.f32 %v816_v58, %v815_v20 }
 0x26e   : > { %v3476_v37 = vpop.f32.mrf.mxu1  ;;  %v827_v55 = vmul.f32 %v763_v44, %v2785_v46  ;;  %v2017_v44 = vunpack.c.l.bf16 %v899_v31  ;;  %v833_v11 = vmul.f32 %v817_v48, %v2785_v46 }
 0x26f   : > { %v819_v36 = vsel %vm517_vm0, %v3476_v37, 0.0 }
 0x270   : > { %v820_v32 = vadd.f32 %v819_v36, %v818_v42  ;;  %v839_v10 = vadd.f32 %v3485_v16, %v827_v55  ;;  %v884_v42 = vadd.f32 %v3513_v49, %v3255_v30  ;;  %v843_v36 = vadd.f32 %v3485_v16, %v831_v47 }
 0x271   : > { %v845_v9 = vadd.f32 %v3485_v16, %v833_v11 }
 0x272   : > { %v821_v52 = vrot.slane %v820_v32, 4  ;;  %v2130_v41 = vsel %vm1043_vm2, %v2129_v8, %v839_v10  ;;  %v2135_v3 = vrot.slane %v843_v36, 4 }
 0x273   : > { %v2132_v2 = vsel %vm1045_vm3, %v2131_v28, %v2130_v41  ;;  %v2139_v45 = vrot.slane %v845_v9, 2  ;;  %v901_v28 = vpack.c.bf16 %v885_v24, %v885_v24 }
 0x274   : > { %v822_v56 = vadd.f32 %v821_v52, %v820_v32  ;;  %v2134_v25 = vsel %vm1047_vm4, %v2133_v21, %v2132_v2  ;;  %v900_v32 = vpack.c.bf16 %v884_v42, %v884_v42 }
 0x275   : > { %v2136_v30 = vsel %vm1049_vm5, %v2135_v3, %v2134_v25  ;;  %v2019_v41 = vunpack.c.l.bf16 %v901_v28 }
 0x276   : > { %v823_v12 = vrot.slane %v822_v56, 2  ;;  %v2018_v33 = vunpack.c.l.bf16 %v900_v32 }
 0x278   : > { %v824_v27 = vadd.f32 %v823_v12, %v822_v56 }
 0x27a   : > { %v825_v54 = vrot.slane %v824_v27, 1 }
 0x27c   : > { %2428 = vmatmul.msk.bf16.gmra.mxu2 %vm1423_vm10, %v1921_v34  ;;  %v806_v34 = vadd.f32 %v805_v4, %v804_v26  ;;  %v826_v39 = vadd.f32 %v825_v54, %v824_v27  ;;  %v887_v27 = vadd.f32 %v3504_v60, %v3359_v38 }
 0x27e   : > { %v834_v55 = vmul.f32 %v826_v39, %v2785_v46  ;;  %v903_v48 = vpack.c.bf16 %v887_v27, %v887_v27 }
 0x280   : > { %v846_v29 = vadd.f32 %v3485_v16, %v834_v55  ;;  %v2021_v39 = vunpack.c.l.bf16 %v903_v48  ;;  %v889_v55 = vadd.f32 %v3504_v60, %v3413_v7  ;;  %v890_v7 = vadd.f32 %v3513_v49, %v3416_v14 }
 0x282   : > { %v2141_v19 = vrot.slane %v846_v29, 1 }
 0x28c   : > { %2429 = vmatmul.msk.bf16.gmra.mxu2 %vm1423_vm10, %v1922_v43  ;;  %v807_v43 = vrot.slane %v806_v34, 1  ;;  %vm3672_vm10 = vmmov %vm3669_vm12 }
 0x28e   : > { %v808_v57 = vadd.f32 %v807_v43, %v806_v34  ;;  %v902_v43 = vpack.c.bf16 %v886_v18, %v886_v18 }
 0x290   : > { %v832_v5 = vmul.f32 %v808_v57, %v2785_v46  ;;  %v2020_v57 = vunpack.c.l.bf16 %v902_v43 }
 0x292   : > { %v844_v6 = vadd.f32 %v3485_v16, %v832_v5 }
 0x294   : > { %v2137_v26 = vrot.slane %v844_v6, 3 }
 0x296   : > { %v2138_v8 = vsel %vm3672_vm10, %v2137_v26, %v2136_v30 }
 0x297   : > { %v2140_v56 = vsel %vm3673_vm14, %v2139_v45, %v2138_v8 }
 0x298   : > { %v2142_v16 = vsel %vm3674_vm15, %v2141_v19, %v2140_v56 }
 0x29f   : > { %v1960_v50 = vpop.f32.mrf.mxu2 }
 0x2a0   : > { %v2033_v1 = vmul.f32 %v2017_v44, %v1960_v50  ;;  %v888_v44 = vadd.f32 %v3513_v49, %v3391_v53 }
 0x2a2   : > { %v2049_v4 = vsel %vm517_vm0, %v2033_v1, 0.0  ;;  %v904_v6 = vpack.c.bf16 %v888_v44, %v888_v44  ;;  %v2461_v44 = vld [vmem:[%s3637_s6] sm:$0xff] }
 0x2a3   : > { %2238 = vmatpush.bf16.msrb.mxu1 %v2461_v44 }
 0x2a4   : > { %v2022_v9 = vunpack.c.l.bf16 %v904_v6 }
 0x2a7   : > { %v1962_v52 = vpop.f32.mrf.mxu2 }
 0x2a8   : > { %v2034_v10 = vmul.f32 %v2018_v33, %v1962_v52  ;;  %v905_v52 = vpack.c.bf16 %v889_v55, %v889_v55 }
 0x2aa   : > { %v2050_v46 = vsel %vm517_vm0, %v2034_v10, 0.0  ;;  %v2023_v19 = vunpack.c.l.bf16 %v905_v52 }
 0x2ab   : > { %v2051_v21 = vadd.f32 %v2050_v46, %v2049_v4 }
 0x2ad   : > { %v2052_v0 = vrot.slane %v2051_v21, 4 }
 0x2ae   : > { %v2013_v2 = vpop.f32.mrf.mxu0 }
 0x2af   : > { %v2053_v34 = vadd.f32 %v2052_v0, %v2051_v21  ;;  %v1965_v59 = vpop.f32.mrf.mxu2  ;;  %v3537_v20 = vmul.f32 %v2142_v16, %v2013_v2 }
 0x2b0   : > { %v2035_v25 = vmul.f32 %v2019_v41, %v1965_v59  ;;  %v906_v59 = vpack.c.bf16 %v890_v7, %v890_v7 }
 0x2b1   : > { %v2054_v12 = vrot.slane %v2053_v34, 2  ;;  %v2146_v30 = vrot.slane %v3537_v20, 1 }
 0x2b2   : > { %v2058_v5 = vsel %vm517_vm0, %v2035_v25, 0.0  ;;  %v2024_v25 = vunpack.c.l.bf16 %v906_v59 }
 0x2b3   : > { %v2055_v35 = vadd.f32 %v2054_v12, %v2053_v34 }
 0x2b5   : > { %v2056_v40 = vrot.slane %v2055_v35, 1 }
 0x2b6   : > { %v2015_v47 = vpop.f32.mrf.mxu0 }
 0x2b7   : > { %v2057_v58 = vadd.f32 %v2056_v40, %v2055_v35  ;;  %v1967_v31 = vpop.f32.mrf.mxu2  ;;  %v2147_v35 = vrot.slane %v3537_v20, 2  ;;  %v891_v47 = vadd.f32 %v3504_v60, %v3427_v23 }
 0x2b8   : > { %v2036_v54 = vmul.f32 %v2020_v57, %v1967_v31 }
 0x2b9   : > { %v2161_v15 = vadd.f32 %v3537_v20, %v2057_v58 }
 0x2ba   : > { %v2059_v17 = vsel %vm517_vm0, %v2036_v54, 0.0 }
 0x2bb   : > { %v2060_v42 = vadd.f32 %v2059_v17, %v2058_v5  ;;  %v2169_v10 = vpack.c.bf16 %v2161_v15, %v2161_v15  ;;  %v892_v5 = vadd.f32 %v3513_v49, %v3429_v63  ;;  %v2148_v63 = vrot.slane %v3537_v20, 3 }
 0x2bd   : > { %v2061_v36 = vrot.slane %v2060_v42, 4  ;;  %v2193_v21 = vunpack.c.l.b16 %v2169_v10 }
 0x2bf   : > { %v2062_v50 = vadd.f32 %v2061_v36, %v2060_v42  ;;  %v1970_v38 = vpop.f32.mrf.mxu2 }
 0x2c0   : > { %v2037_v1 = vmul.f32 %v2021_v39, %v1970_v38  ;;  %v907_v39 = vpack.c.bf16 %v891_v47, %v891_v47 }
 0x2c1   : > { %v2063_v11 = vrot.slane %v2062_v50, 2 }
 0x2c2   : > { %v2067_v53 = vsel %vm517_vm0, %v2037_v1, 0.0  ;;  %v908_v1 = vpack.c.bf16 %v892_v5, %v892_v5  ;;  %v2025_v23 = vunpack.c.l.bf16 %v907_v39 }
 0x2c3   : > { %v2064_v32 = vadd.f32 %v2063_v11, %v2062_v50 }
 0x2c5   : > { %v2065_v3 = vrot.slane %v2064_v32, 1 }
 0x2c7   : > { %v2066_v26 = vadd.f32 %v2065_v3, %v2064_v32  ;;  %v1972_v33 = vpop.f32.mrf.mxu2  ;;  %v2026_v3 = vunpack.c.l.bf16 %v908_v1 }
 0x2c8   : > { %v2038_v24 = vmul.f32 %v2022_v9, %v1972_v33 }
 0x2c9   : > { %v2162_v29 = vadd.f32 %v2146_v30, %v2066_v26 }
 0x2ca   : > { %v2068_v45 = vsel %vm517_vm0, %v2038_v24, 0.0 }
 0x2cb   : > { %v2170_v8 = vpack.c.bf16 %v2162_v29, %v2162_v29  ;;  %v2069_v4 = vadd.f32 %v2068_v45, %v2067_v53  ;;  %v893_v53 = vadd.f32 %v3504_v60, %v3435_v22  ;;  %v2149_v22 = vrot.slane %v3537_v20, 4 }
 0x2cd   : > { %v2194_v46 = vunpack.c.l.b16 %v2170_v8  ;;  %v2070_v28 = vrot.slane %v2069_v4, 4  ;;  %v894_v8 = vadd.f32 %v3513_v49, %v3437_v13  ;;  %v909_v7 = vpack.c.bf16 %v893_v53, %v893_v53 }
 0x2cf   : > { %v2201_v56 = vrot.slane %v2194_v46, 7  ;;  %v2071_v0 = vadd.f32 %v2070_v28, %v2069_v4  ;;  %v1975_v18 = vpop.f32.mrf.mxu2 }
 0x2d0   : > { %v2039_v16 = vmul.f32 %v2023_v19, %v1975_v18  ;;  %v2027_v18 = vunpack.c.l.bf16 %v909_v7 }
 0x2d1   : > { %v2202_v34 = vsel %vm1043_vm2, %v2201_v56, %v2193_v21  ;;  %v2072_v41 = vrot.slane %v2071_v0, 2  ;;  %v910_v21 = vpack.c.bf16 %v894_v8, %v894_v8  ;;  %vm3675_vm2 = vmmov %vm3672_vm10 }
 0x2d2   : > { %v2076_v14 = vsel %vm517_vm0, %v2039_v16, 0.0 }
 0x2d3   : > { %v2073_v2 = vadd.f32 %v2072_v41, %v2071_v0  ;;  %v2028_v41 = vunpack.c.l.bf16 %v910_v21 }
 0x2d5   : > { %v2074_v12 = vrot.slane %v2073_v2, 1 }
 0x2d7   : > { %v2075_v43 = vadd.f32 %v2074_v12, %v2073_v2  ;;  %v1977_v40 = vpop.f32.mrf.mxu2 }
 0x2d8   : > { %v2040_v27 = vmul.f32 %v2024_v25, %v1977_v40 }
 0x2d9   : > { %v2163_v58 = vadd.f32 %v2147_v35, %v2075_v43 }
 0x2da   : > { %v2077_v57 = vsel %vm517_vm0, %v2040_v27, 0.0  ;;  %v895_v27 = vadd.f32 %v3504_v60, %v3443_v62  ;;  %v2150_v62 = vrot.slane %v3537_v20, 5 }
 0x2db   : > { %v2171_v31 = vpack.c.bf16 %v2163_v58, %v2163_v58  ;;  %v2078_v15 = vadd.f32 %v2077_v57, %v2076_v14  ;;  %v896_v57 = vadd.f32 %v3513_v49, %v3452_v61 }
 0x2dd   : > { %v2195_v54 = vunpack.c.l.b16 %v2171_v31  ;;  %v2079_v48 = vrot.slane %v2078_v15, 4  ;;  %v912_v5 = vpack.c.bf16 %v896_v57, %v896_v57 }
 0x2df   : > { %v2203_v17 = vrot.slane %v2195_v54, 6  ;;  %v2080_v42 = vadd.f32 %v2079_v48, %v2078_v15  ;;  %v1980_v36 = vpop.f32.mrf.mxu2  ;;  %v911_v54 = vpack.c.bf16 %v895_v27, %v895_v27 }
 0x2e0   : > { %v2041_v32 = vmul.f32 %v2025_v23, %v1980_v36 }
 0x2e1   : > { %v2204_v50 = vsel %vm1045_vm3, %v2203_v17, %v2202_v34  ;;  %v2081_v38 = vrot.slane %v2080_v42, 2  ;;  %v2029_v36 = vunpack.c.l.bf16 %v911_v54  ;;  %vm3676_vm3 = vmmov %vm3670_vm8 }
 0x2e2   : > { %v2085_v33 = vsel %vm517_vm0, %v2041_v32, 0.0 }
 0x2e3   : > { %v2082_v11 = vadd.f32 %v2081_v38, %v2080_v42 }
 0x2e5   : > { %v2083_v6 = vrot.slane %v2082_v11, 1 }
 0x2e7   : > { %v2084_v55 = vadd.f32 %v2083_v6, %v2082_v11  ;;  %v1982_v9 = vpop.f32.mrf.mxu2 }
 0x2e8   : > { %v2042_v26 = vmul.f32 %v2026_v3, %v1982_v9 }
 0x2e9   : > { %v2164_v30 = vadd.f32 %v2148_v63, %v2084_v55  ;;  %v897_v55 = vadd.f32 %v3504_v60, %v3461_v51  ;;  %v2151_v51 = vrot.slane %v3537_v20, 6 }
 0x2ea   : > { %v2086_v24 = vsel %vm517_vm0, %v2042_v26, 0.0  ;;  %v898_v26 = vadd.f32 %v3513_v49, %v3476_v37 }
 0x2eb   : > { %v2172_v29 = vpack.c.bf16 %v2164_v30, %v2164_v30  ;;  %v2087_v52 = vadd.f32 %v2086_v24, %v2085_v33 }
 0x2ed   : > { %v2196_v45 = vunpack.c.l.b16 %v2172_v29  ;;  %v2088_v10 = vrot.slane %v2087_v52, 4  ;;  %v913_v29 = vpack.c.bf16 %v897_v55, %v897_v55 }
 0x2ef   : > { %v2205_v4 = vrot.slane %v2196_v45, 5  ;;  %v2089_v46 = vadd.f32 %v2088_v10, %v2087_v52  ;;  %v1985_v28 = vpop.f32.mrf.mxu2  ;;  %v914_v45 = vpack.c.bf16 %v898_v26, %v898_v26  ;;  %v2031_v8 = vunpack.c.l.bf16 %v913_v29 }
 0x2f0   : > { %v2043_v34 = vmul.f32 %v2027_v18, %v1985_v28 }
 0x2f1   : > { %v2090_v19 = vrot.slane %v2089_v46, 2  ;;  %v2206_v0 = vsel %vm1047_vm4, %v2205_v4, %v2204_v50  ;;  %v2030_v50 = vunpack.c.l.bf16 %v912_v5  ;;  %v2032_v28 = vunpack.c.l.bf16 %v914_v45  ;;  %vm3677_vm4 = vmmov %vm3671_vm6 }
 0x2f2   : > { %v2094_v13 = vsel %vm517_vm0, %v2043_v34, 0.0 }
 0x2f3   : > { %v2091_v56 = vadd.f32 %v2090_v19, %v2089_v46 }
 0x2f5   : > { %v2092_v16 = vrot.slane %v2091_v56, 1 }
 0x2f7   : > { %v2093_v59 = vadd.f32 %v2092_v16, %v2091_v56  ;;  %v1987_v2 = vpop.f32.mrf.mxu2 }
 0x2f8   : > { %v2044_v12 = vmul.f32 %v2028_v41, %v1987_v2 }
 0x2f9   : > { %v2165_v25 = vadd.f32 %v2149_v22, %v2093_v59 }
 0x2fa   : > { %v2095_v43 = vsel %vm517_vm0, %v2044_v12, 0.0 }
 0x2fb   : > { %v2173_v35 = vpack.c.bf16 %v2165_v25, %v2165_v25  ;;  %v2096_v40 = vadd.f32 %v2095_v43, %v2094_v13  ;;  %v2152_v13 = vrot.slane %v3537_v20, 7  ;;  %v2506_v20 = vld [vmem:[%s3643_s12] ss:$0 sm:$0xff] }
 0x2fd   : > { %v2197_v58 = vunpack.c.l.b16 %v2173_v35  ;;  %v2097_v14 = vrot.slane %v2096_v40, 4 }
 0x2ff   : > { %v2207_v31 = vrot.slane %v2197_v58, 4  ;;  %v2098_v15 = vadd.f32 %v2097_v14, %v2096_v40  ;;  %v1990_v47 = vpop.f32.mrf.mxu2 }
 0x300   : > { %v2045_v39 = vmul.f32 %v2029_v36, %v1990_v47 }
 0x301   : > { %v2099_v48 = vrot.slane %v2098_v15, 2  ;;  %v2208_v42 = vsel %vm1049_vm5, %v2207_v31, %v2206_v0 }
 0x302   : > { %v2103_v61 = vsel %vm517_vm0, %v2045_v39, 0.0 }
 0x303   : > { %v2100_v17 = vadd.f32 %v2099_v48, %v2098_v15 }
 0x305   : > { %v2101_v44 = vrot.slane %v2100_v17, 1 }
 0x307   : > { %v2102_v38 = vadd.f32 %v2101_v44, %v2100_v17  ;;  %v1992_v1 = vpop.f32.mrf.mxu2 }
 0x308   : > { %v2046_v11 = vmul.f32 %v2030_v50, %v1992_v1 }
 0x309   : > { %v2166_v23 = vadd.f32 %v2150_v62, %v2102_v38 }
 0x30a   : > { %v2104_v6 = vsel %vm517_vm0, %v2046_v11, 0.0 }
 0x30b   : > { %v2174_v32 = vpack.c.bf16 %v2166_v23, %v2166_v23  ;;  %v2105_v3 = vadd.f32 %v2104_v6, %v2103_v61 }
 0x30d   : > { %v2198_v63 = vunpack.c.l.b16 %v2174_v32  ;;  %v2106_v9 = vrot.slane %v2105_v3, 4 }
 0x30f   : > { %v2209_v30 = vrot.slane %v2198_v63, 3  ;;  %v2107_v33 = vadd.f32 %v2106_v9, %v2105_v3  ;;  %v1995_v24 = vpop.f32.mrf.mxu2 }
 0x310   : > { %v2047_v46 = vmul.f32 %v2031_v8, %v1995_v24 }
 0x311   : > { %v2108_v52 = vrot.slane %v2107_v33, 2  ;;  %v2210_v53 = vsel %vm3675_vm2, %v2209_v30, %v2208_v42 }
 0x312   : > { %v2112_v37 = vsel %vm517_vm0, %v2047_v46, 0.0 }
 0x313   : > { %v2109_v10 = vadd.f32 %v2108_v52, %v2107_v33 }
 0x315   : > { %v2110_v4 = vrot.slane %v2109_v10, 1 }
 0x317   : > { %v2111_v7 = vadd.f32 %v2110_v4, %v2109_v10  ;;  %v1997_v60 = vpop.f32.mrf.mxu2 }
 0x318   : > { %v2048_v19 = vmul.f32 %v2032_v28, %v1997_v60 }
 0x319   : > { %v2167_v21 = vadd.f32 %v2151_v51, %v2111_v7 }
 0x31a   : > { %v2113_v49 = vsel %vm517_vm0, %v2048_v19, 0.0 }
 0x31b   : > { %v2175_v56 = vpack.c.bf16 %v2167_v21, %v2167_v21  ;;  %v2114_v0 = vadd.f32 %v2113_v49, %v2112_v37 }
 0x31d   : > { %v2199_v18 = vunpack.c.l.b16 %v2175_v56  ;;  %v2115_v16 = vrot.slane %v2114_v0, 4 }
 0x31f   : > { %v2211_v34 = vrot.slane %v2199_v18, 2  ;;  %v2116_v41 = vadd.f32 %v2115_v16, %v2114_v0 }
 0x321   : > { %v2117_v59 = vrot.slane %v2116_v41, 2  ;;  %v2212_v22 = vsel %vm3676_vm3, %v2211_v34, %v2210_v53 }
 0x323   : > { %v2118_v2 = vadd.f32 %v2117_v59, %v2116_v41 }
 0x325   : > { %v2119_v12 = vrot.slane %v2118_v2, 1 }
 0x327   : > { %v2120_v25 = vadd.f32 %v2119_v12, %v2118_v2 }
 0x329   : > { %v2168_v43 = vadd.f32 %v2152_v13, %v2120_v25 }
 0x32b   : > { %v2176_v35 = vpack.c.bf16 %v2168_v43, %v2168_v43 }
 0x32d   : > { %v2200_v40 = vunpack.c.l.b16 %v2176_v35 }
 0x32f   : > { %v2213_v27 = vrot.slane %v2200_v40, 1 }
 0x331   : > { %v2214_v58 = vsel %vm3677_vm4, %v2213_v27, %v2212_v22 }
 0x332   : > { %v2215_v14 = vpack.c.b16 %v2214_v58, %v2214_v58 }
 0x334   : > { %2439 = vmatmul.msk.bf16.vlgmr.msrb.gmra.mxu1 %vm517_vm0, %v2215_v14 }
 0x3b1   : > { %v2240_v57 = vpop.f32.mrf.mxu1 }
 0x3b2   : > { %v2241_v31 = vadd.f32 %v2506_v20, %v2240_v57 }
 0x3b4   : > { %2244 = vst [vmem:[%s436_s15] sm:$0xff] %v2241_v31 }
 0x3b5   : > { %2588 = shalt.err (!%p2585_p3)
}
 0x3b6   : > { %2463 = dma.vmem_to_hbm [thread:$0]  (%p2731_p5), %s2259_s17, 128, %s2261_s0, %s2246_s1  }
 0x3b9   : > { %v2242_v15 = vpop.f32.mrf.mxu1 }
 0x3ba PF: > { %p2469_p4 = scmp.ge.s32.totalorder %s2623_s28, 2  ;;  %s2272_s16 = sand.u32 1, %s2611_s25  }
 0x3bb   : > { %s2273_s23 = scalar_lea.sflag [#allocation3], %s2272_s16 }
 0x3bc   : > { %p2466_p7 = pnand %p2469_p4, %p2735_p6 }
 0x3be   : > { %p2467_p8 = pneg %p2466_p7 }
 0x3c0   : > { %2606 = dma.done.wait (%p2467_p8), %s2273_s23, 128  }
 0x3c1   : > { %2608 = vsyncadd (%p2467_p8), %s2273_s23, 4294967168  ;;  %s3678_s2 = sld [smem:[#allocation5_spill]]  ;;  %p23_p9 = scmp.ge.s32.totalorder %s2719_s14, 4  }
 0x3c2   : > { %s3679_s25 = smov %s2615_s26  ;;  %s3680_s26 = smov %s2619_s27 }
 0x3c3   : > { %s3682_s28 = smov %s2719_s14  ;;  %25 = sbr.rel (!%p23_p9) target bundleno = 8 (0x8), region = 107 }
 0x3c7   : > { %s3681_s27 = smov %s3678_s2 }
 0x3c8   :  { %2279 = vsyncpa [#allocation3], 1 }
 0x3c9   :  { %2281 = vsyncpa [#allocation3 + $0x1], 1 }

</bundles_post_ra>
